<compile_context>
chip_gen: v7x
topology: tpu7x:2x2x1
jax: 0.10.0
libtpu: 0.0.40
codegen_flags: <defaults>
</compile_context>

<pallas_src>
import functools
import math

import jax
import jax.numpy as jnp
import numpy as np
from jax import lax
from jax.experimental import pallas as pl
from jax.experimental.pallas import tpu as pltpu


# ----------------------------------------------------------------------------
# Kernel bodies
# ----------------------------------------------------------------------------

def _attention_and_out_proj(qp_ref, kp_ref, vp_ref, ctx_ref, wo_ref, bo_ref,
                            o_ref, *, heads, d_k, b_tile, seq):
    """Per-(batch, head) softmax(q k^T) v into ctx columns, then ONE out-proj.

    qp/kp/vp/ctx: (b_tile*seq, D) VMEM scratch in the MXU dtype.
    The 1/sqrt(d_k) scale is already folded into the Q projection params.
    """
    mxu_dtype = wo_ref.dtype

    def one_batch(row_start):
        rows = pl.ds(row_start, seq)
        for h in range(heads):                        # static -> static col offsets
            cols = pl.ds(h * d_k, d_k)
            qh = qp_ref[rows, cols]                   # (seq, d_k)
            kh = kp_ref[rows, cols]
            vh = vp_ref[rows, cols]

            # q @ k^T via NT-form dot_general (contract last dims, no explicit
            # kh.T).  Scale already folded into wq/bq.
            scores = lax.dot_general(
                qh, kh, (((1,), (1,)), ((), ())),
                preferred_element_type=jnp.float32)   # (seq, seq) f32

            # Numerically stable softmax in f32.  Reciprocal on the EUP slot
            # plus one Newton step for near-exact parity with a true divide.
            scores = scores - jnp.max(scores, axis=-1, keepdims=True)
            e = jnp.exp(scores)
            s = jnp.sum(e, axis=-1, keepdims=True)
            inv = pl.reciprocal(s, approx=True)
            inv = inv * (2.0 - s * inv)
            probs = (e * inv).astype(mxu_dtype)

            head_out = jnp.dot(probs, vh, preferred_element_type=jnp.float32)
            # Write the head output into its column slice; the output
            # projection is done once below with full contraction depth K=D.
            ctx_ref[rows, cols] = head_out.astype(mxu_dtype)

    if b_tile <= 4:
        # Small tile: static unroll, every offset static.
        for b in range(b_tile):
            one_batch(b * seq)
    else:
        # Large tile: pl.loop bounds live ranges and code size.
        @pl.loop(0, b_tile)
        def _(b):
            one_batch(pl.multiple_of(b * seq, seq))

    # Single (M, D) @ (D, D) output projection (full MXU contraction depth).
    out = jnp.dot(ctx_ref[...], wo_ref[...], preferred_element_type=jnp.float32)
    o_ref[...] = (out + bo_ref[...].astype(jnp.float32)).astype(o_ref.dtype)


def _mha_cross_kernel(q_ref, k_ref, v_ref, wqkv_ref, bqkv_ref, wo_ref, bo_ref,
                      o_ref, qp_ref, kp_ref, vp_ref, ctx_ref,
                      *, heads, d_k, b_tile, seq):
    """General path: q, k, v are distinct (M, D) tiles."""
    D = heads * d_k
    mxu = wqkv_ref.dtype
    bqkv = bqkv_ref[...].astype(jnp.float32)                  # (1, 3D)

    # Three column-block projections, written straight to scratch in the MXU
    # dtype (no resident f32 (M, 3D) intermediate).
    qp_ref[...] = (jnp.dot(q_ref[...], wqkv_ref[:, 0:D],
                           preferred_element_type=jnp.float32)
                   + bqkv[:, 0:D]).astype(mxu)
    kp_ref[...] = (jnp.dot(k_ref[...], wqkv_ref[:, D:2 * D],
                           preferred_element_type=jnp.float32)
                   + bqkv[:, D:2 * D]).astype(mxu)
    vp_ref[...] = (jnp.dot(v_ref[...], wqkv_ref[:, 2 * D:3 * D],
                           preferred_element_type=jnp.float32)
                   + bqkv[:, 2 * D:3 * D]).astype(mxu)

    _attention_and_out_proj(qp_ref, kp_ref, vp_ref, ctx_ref, wo_ref, bo_ref,
                            o_ref, heads=heads, d_k=d_k, b_tile=b_tile, seq=seq)


def _mha_self_kernel(x_ref, wqkv_ref, bqkv_ref, wo_ref, bo_ref,
                     o_ref, qp_ref, kp_ref, vp_ref, ctx_ref,
                     *, heads, d_k, b_tile, seq):
    """Self-attention path: one activation input DMA, three projections."""
    D = heads * d_k
    mxu = wqkv_ref.dtype
    bqkv = bqkv_ref[...].astype(jnp.float32)
    x = x_ref[...]

    qp_ref[...] = (jnp.dot(x, wqkv_ref[:, 0:D],
                           preferred_element_type=jnp.float32)
                   + bqkv[:, 0:D]).astype(mxu)
    kp_ref[...] = (jnp.dot(x, wqkv_ref[:, D:2 * D],
                           preferred_element_type=jnp.float32)
                   + bqkv[:, D:2 * D]).astype(mxu)
    vp_ref[...] = (jnp.dot(x, wqkv_ref[:, 2 * D:3 * D],
                           preferred_element_type=jnp.float32)
                   + bqkv[:, 2 * D:3 * D]).astype(mxu)

    _attention_and_out_proj(qp_ref, kp_ref, vp_ref, ctx_ref, wo_ref, bo_ref,
                            o_ref, heads=heads, d_k=d_k, b_tile=b_tile, seq=seq)


# ----------------------------------------------------------------------------
# VMEM budgeting / tile selection (generation-aware)
# ----------------------------------------------------------------------------

def _vmem_limit_bytes():
    """Scoped-VMEM limit at ~75% of physical per-core VMEM (v7x 64 MiB -> 48,
    v5e/v6e 128 MiB -> 96)."""
    try:
        cap = int(pltpu.get_tpu_info().vmem_capacity_bytes)
    except Exception:
        cap = 64 * 1024 * 1024            # conservative (v7x-sized) fallback
    return max(16 * 1024 * 1024, (cap * 3) // 4)


def _estimate_vmem_bytes(b_tile, seq, D, mxu_itemsize, n_act_inputs,
                         weight_bufs=1):
    """Conservative count of everything resident in VMEM for one grid step."""
    M = b_tile * seq
    weights = weight_bufs * (3 * D * D + D * D + 4 * D) * mxu_itemsize
    act_in = 2 * n_act_inputs * M * D * mxu_itemsize   # double-buffered inputs
    act_out = 2 * M * D * 4                            # f32 output, 2 buffers
    scratch = 4 * M * D * mxu_itemsize                 # qp, kp, vp, ctx
    proj_tmp = M * D * 4                               # f32 matmul result pre-cast
    attn_tmp = 4 * seq * seq * 4                       # scores / exp / probs (f32)
    return weights + act_in + act_out + scratch + proj_tmp + attn_tmp


def _choose_b_tile(bs, seq, D, mxu_itemsize, n_act_inputs, budget_bytes,
                   target_rows=512):
    """Largest batch tile that divides bs, fits the VMEM budget, gives the MXU
    >= target_rows rows per matmul, and keeps the grid length >= 2 so both
    v7x TensorCores get work (harmless on 1-TC v5e/v6e)."""
    max_bt = bs if bs < 2 else max(1, bs // 2)
    best = 1
    for bt in range(1, max_bt + 1):
        if bs % bt:
            continue
        if _estimate_vmem_bytes(bt, seq, D, mxu_itemsize, n_act_inputs) > budget_bytes:
            break
        best = bt
        if bt * seq >= target_rows:
            break
    return best


# ----------------------------------------------------------------------------
# Wrapper
# ----------------------------------------------------------------------------

def multi_head_attention(q, k, v, params, heads, *,
                         compute_dtype=jnp.float32, out_dtype=jnp.float32,
                         b_tile=None, self_attention=False):
    """q, k, v: (bs, S, D) float32.  params: (in, out)-layout weights/biases.

    compute_dtype: MXU operand dtype.  bfloat16 is recommended on ALL TPU
    generations (the v5e MXU is bf16-native too); softmax, biases and all
    accumulation stay float32 regardless.
    """
    bs, S, D = q.shape
    assert D % heads == 0, "d_model must be divisible by heads"
    d_k = D // heads
    scale = 1.0 / math.sqrt(d_k)

    # Fused QKV params with 1/sqrt(d_k) folded into the Q columns (free).
    wqkv = jnp.concatenate(
        [params["wq"] * scale, params["wk"], params["wv"]], axis=1
    ).astype(compute_dtype)                                   # (D, 3D)
    bqkv = jnp.concatenate(
        [params["bq"] * scale, params["bk"], params["bv"]], axis=1
    ).astype(jnp.float32)                                     # (1, 3D)
    wo = params["wo"].astype(compute_dtype)
    bo = params["bo"].astype(jnp.float32)

    itemsize = jnp.dtype(compute_dtype).itemsize
    n_act_inputs = 1 if self_attention else 3
    vmem_limit = _vmem_limit_bytes()
    if b_tile is None:
        b_tile = _choose_b_tile(bs, S, D, itemsize, n_act_inputs,
                                budget_bytes=int(vmem_limit * 0.9))
    assert bs % b_tile == 0, "batch must be divisible by the batch tile"
    M = b_tile * S

    # Flatten activations to (bs*S, D): kernel blocks are lane-dense 2-D row
    # slabs and no in-kernel reshape is needed.
    q2 = q.astype(compute_dtype).reshape(bs * S, D)

    def act_spec():
        return pl.BlockSpec((M, D), lambda i: (i, 0))

    def weight_specs(single_buffer):
        kwargs = dict(pipeline_mode=pl.Buffered(1)) if single_buffer else {}
        return [pl.BlockSpec((D, 3 * D), lambda i: (0, 0), **kwargs),
                pl.BlockSpec((1, 3 * D), lambda i: (0, 0), **kwargs),
                pl.BlockSpec((D, D), lambda i: (0, 0), **kwargs),
                pl.BlockSpec((1, D), lambda i: (0, 0), **kwargs)]

    scratch = [pltpu.VMEM((M, D), compute_dtype) for _ in range(4)]
    cp = pltpu.CompilerParams(dimension_semantics=("parallel",),
                              vmem_limit_bytes=int(vmem_limit))
    out_shape = jax.ShapeDtypeStruct((bs * S, D), out_dtype)
    grid = (bs // b_tile,)

    def run(single_buffer_weights):
        wspecs = weight_specs(single_buffer_weights)
        if self_attention:
            kern = functools.partial(_mha_self_kernel, heads=heads, d_k=d_k,
                                     b_tile=b_tile, seq=S)
            out2 = pl.pallas_call(
                kern, out_shape=out_shape, grid=grid,
                in_specs=[act_spec()] + wspecs,
                out_specs=act_spec(),
                scratch_shapes=scratch, compiler_params=cp,
            )(q2, wqkv, bqkv, wo, bo)
        else:
            k2 = k.astype(compute_dtype).reshape(bs * S, D)
            v2 = v.astype(compute_dtype).reshape(bs * S, D)
            kern = functools.partial(_mha_cross_kernel, heads=heads, d_k=d_k,
                                     b_tile=b_tile, seq=S)
            out2 = pl.pallas_call(
                kern, out_shape=out_shape, grid=grid,
                in_specs=[act_spec()] * 3 + wspecs,
                out_specs=act_spec(),
                scratch_shapes=scratch, compiler_params=cp,
            )(q2, k2, v2, wqkv, bqkv, wo, bo)
        return out2.reshape(bs, S, D)

    try:
        # Grid-invariant weights: single-buffered (halves weight VMEM).
        return run(single_buffer_weights=True)
    except Exception:
        # pl.Buffered(1) not accepted by this jax version -> default buffering.
        return run(single_buffer_weights=False)


# ----------------------------------------------------------------------------
# Pure-JAX reference and param init
# ----------------------------------------------------------------------------

def reference_mha(q, k, v, params, heads):
    """Pure-JAX reference mirroring the PyTorch forward (eval mode)."""
    bs, S, D = q.shape
    d_k = D // heads

    def lin(x, w, b):
        return x @ w + b  # w already (in, out)

    qp = lin(q, params["wq"], params["bq"]).reshape(bs, S, heads, d_k).transpose(0, 2, 1, 3)
    kp = lin(k, params["wk"], params["bk"]).reshape(bs, S, heads, d_k).transpose(0, 2, 1, 3)
    vp = lin(v, params["wv"], params["bv"]).reshape(bs, S, heads, d_k).transpose(0, 2, 1, 3)

    scores = jnp.einsum("bhqd,bhkd->bhqk", qp, kp) / math.sqrt(d_k)
    probs = jax.nn.softmax(scores, axis=-1)
    out = jnp.einsum("bhqk,bhkd->bhqd", probs, vp)
    concat = out.transpose(0, 2, 1, 3).reshape(bs, S, D)
    return lin(concat, params["wo"], params["bo"])


def init_params(key, d_model):
    """Deterministic init matching nn.Linear shapes (stored transposed)."""
    ks = jax.random.split(key, 8)
    bound = 1.0 / math.sqrt(d_model)

    def w(kk):
        return jax.random.uniform(kk, (d_model, d_model), jnp.float32, -bound, bound)

    def b(kk):
        return jax.random.uniform(kk, (1, d_model), jnp.float32, -bound, bound)

    return {
        "wq": w(ks[0]), "bq": b(ks[1]),
        "wk": w(ks[2]), "bk": b(ks[3]),
        "wv": w(ks[4]), "bv": b(ks[5]),
        "wo": w(ks[6]), "bo": b(ks[7]),
    }


if __name__ == "__main__":
    bs, S, d_model, heads = 2, 8, 32, 4

    key = jax.random.PRNGKey(0)
    kq, kk, kv, kp = jax.random.split(key, 4)

    q = jax.random.normal(kq, (bs, S, d_model), jnp.float32)
    k = jax.random.normal(kk, (bs, S, d_model), jnp.float32)
    v = jax.random.normal(kv, (bs, S, d_model), jnp.float32)
    params = init_params(kp, d_model)

    ref = jax.block_until_ready(reference_mha(q, k, v, params, heads))

    # 1) General (cross-attention) path, f32 MXU operands.
    out = jax.block_until_ready(multi_head_attention(q, k, v, params, heads))
    np.testing.assert_allclose(np.asarray(out), np.asarray(ref),
                               atol=2e-3, rtol=2e-3)

    # 2) Self-attention path (single activation input DMA).
    ref_sa = jax.block_until_ready(reference_mha(q, q, q, params, heads))
    out_sa = jax.block_until_ready(
        multi_head_attention(q, q, q, params, heads, self_attention=True))
    np.testing.assert_allclose(np.asarray(out_sa), np.asarray(ref_sa),
                               atol=2e-3, rtol=2e-3)

    # 3) bf16 MXU operands (recommended on all generations); f32 accumulation.
    out_bf16 = jax.block_until_ready(
        multi_head_attention(q, k, v, params, heads,
                             compute_dtype=jnp.bfloat16))
    np.testing.assert_allclose(np.asarray(out_bf16), np.asarray(ref),
                               atol=1e-1, rtol=1e-1)

    print("KERNEL_OK")
</pallas_src>

<mosaic_0001>
module attributes {stable_mosaic.version = 11 : i64} {
  func.func @_mha_cross_kernel(%arg0: i32, %arg1: memref<8x32xf32, #tpu.memory_space<vmem>>, %arg2: memref<8x32xf32, #tpu.memory_space<vmem>>, %arg3: memref<8x32xf32, #tpu.memory_space<vmem>>, %arg4: memref<32x96xf32, #tpu.memory_space<vmem>>, %arg5: memref<1x96xf32, #tpu.memory_space<vmem>>, %arg6: memref<32x32xf32, #tpu.memory_space<vmem>>, %arg7: memref<1x32xf32, #tpu.memory_space<vmem>>, %arg8: memref<8x32xf32, #tpu.memory_space<vmem>>, %arg9: memref<8x32xf32, #tpu.memory_space<vmem>>, %arg10: memref<8x32xf32, #tpu.memory_space<vmem>>, %arg11: memref<8x32xf32, #tpu.memory_space<vmem>>, %arg12: memref<8x32xf32, #tpu.memory_space<vmem>>) attributes {dimension_semantics = [#tpu.dimension_semantics<parallel>], iteration_bounds = array<i64: 2>, scalar_prefetch = 0 : i64, scratch_operands = 4 : i64, tpu.core_type = #tpu.core_type<tc>, window_params = [{transform_indices = @transform_0, window_bounds = array<i64: 8, 32>}, {transform_indices = @transform_1, window_bounds = array<i64: 8, 32>}, {transform_indices = @transform_2, window_bounds = array<i64: 8, 32>}, {pipeline_mode = #tpu.pipeline_mode<synchronous>, transform_indices = @transform_3, window_bounds = array<i64: 32, 96>}, {pipeline_mode = #tpu.pipeline_mode<synchronous>, transform_indices = @transform_4, window_bounds = array<i64: 1, 96>}, {pipeline_mode = #tpu.pipeline_mode<synchronous>, transform_indices = @transform_5, window_bounds = array<i64: 32, 32>}, {pipeline_mode = #tpu.pipeline_mode<synchronous>, transform_indices = @transform_6, window_bounds = array<i64: 1, 32>}, {transform_indices = @transform_7, window_bounds = array<i64: 8, 32>}]} {
    %c0 = arith.constant 0 : index
    %c0_0 = arith.constant 0 : index
    %0 = vector.load %arg5[%c0, %c0_0] : memref<1x96xf32, #tpu.memory_space<vmem>>, vector<1x96xf32>
    %c0_1 = arith.constant 0 : index
    %c0_2 = arith.constant 0 : index
    %1 = vector.load %arg1[%c0_1, %c0_2] : memref<8x32xf32, #tpu.memory_space<vmem>>, vector<8x32xf32>
    %c0_3 = arith.constant 0 : index
    %c0_4 = arith.constant 0 : index
    %2 = vector.load %arg4[%c0_3, %c0_4] : memref<32x96xf32, #tpu.memory_space<vmem>>, vector<32x32xf32>
    %cst = arith.constant dense<0.000000e+00> : vector<8x32xf32>
    %3 = tpu.matmul %1, %2, %cst {dimension_numbers = #tpu.dot_dimension_numbers<[1], [0], [0], [1], [0, 0, 1, 1], [], []>} : vector<8x32xf32>, vector<32x32xf32>, vector<8x32xf32> -> vector<8x32xf32>
    %4 = vector.extract_strided_slice %0 {offsets = [0, 0], sizes = [1, 32], strides = [1, 1]} : vector<1x96xf32> to vector<1x32xf32>
    %5 = vector.broadcast %4 : vector<1x32xf32> to vector<8x32xf32>
    %6 = arith.addf %3, %5 : vector<8x32xf32>
    %c0_5 = arith.constant 0 : index
    %c0_6 = arith.constant 0 : index
    %7 = vector.load %arg9[%c0_5, %c0_6] : memref<8x32xf32, #tpu.memory_space<vmem>>, vector<8x32xf32>
    tpu.vector_store %arg9[%c0_5, %c0_6], %6 {strides = array<i32>} : memref<8x32xf32, #tpu.memory_space<vmem>>, vector<8x32xf32>,
    %c0_7 = arith.constant 0 : index
    %c0_8 = arith.constant 0 : index
    %8 = vector.load %arg2[%c0_7, %c0_8] : memref<8x32xf32, #tpu.memory_space<vmem>>, vector<8x32xf32>
    %c0_9 = arith.constant 0 : index
    %c32 = arith.constant 32 : index
    %9 = vector.load %arg4[%c0_9, %c32] : memref<32x96xf32, #tpu.memory_space<vmem>>, vector<32x32xf32>
    %cst_10 = arith.constant dense<0.000000e+00> : vector<8x32xf32>
    %10 = tpu.matmul %8, %9, %cst_10 {dimension_numbers = #tpu.dot_dimension_numbers<[1], [0], [0], [1], [0, 0, 1, 1], [], []>} : vector<8x32xf32>, vector<32x32xf32>, vector<8x32xf32> -> vector<8x32xf32>
    %11 = vector.extract_strided_slice %0 {offsets = [0, 32], sizes = [1, 32], strides = [1, 1]} : vector<1x96xf32> to vector<1x32xf32>
    %12 = vector.broadcast %11 : vector<1x32xf32> to vector<8x32xf32>
    %13 = arith.addf %10, %12 : vector<8x32xf32>
    %c0_11 = arith.constant 0 : index
    %c0_12 = arith.constant 0 : index
    %14 = vector.load %arg10[%c0_11, %c0_12] : memref<8x32xf32, #tpu.memory_space<vmem>>, vector<8x32xf32>
    tpu.vector_store %arg10[%c0_11, %c0_12], %13 {strides = array<i32>} : memref<8x32xf32, #tpu.memory_space<vmem>>, vector<8x32xf32>,
    %c0_13 = arith.constant 0 : index
    %c0_14 = arith.constant 0 : index
    %15 = vector.load %arg3[%c0_13, %c0_14] : memref<8x32xf32, #tpu.memory_space<vmem>>, vector<8x32xf32>
    %c0_15 = arith.constant 0 : index
    %c64 = arith.constant 64 : index
    %16 = vector.load %arg4[%c0_15, %c64] : memref<32x96xf32, #tpu.memory_space<vmem>>, vector<32x32xf32>
    %cst_16 = arith.constant dense<0.000000e+00> : vector<8x32xf32>
    %17 = tpu.matmul %15, %16, %cst_16 {dimension_numbers = #tpu.dot_dimension_numbers<[1], [0], [0], [1], [0, 0, 1, 1], [], []>} : vector<8x32xf32>, vector<32x32xf32>, vector<8x32xf32> -> vector<8x32xf32>
    %18 = vector.extract_strided_slice %0 {offsets = [0, 64], sizes = [1, 32], strides = [1, 1]} : vector<1x96xf32> to vector<1x32xf32>
    %19 = vector.broadcast %18 : vector<1x32xf32> to vector<8x32xf32>
    %20 = arith.addf %17, %19 : vector<8x32xf32>
    %c0_17 = arith.constant 0 : index
    %c0_18 = arith.constant 0 : index
    %21 = vector.load %arg11[%c0_17, %c0_18] : memref<8x32xf32, #tpu.memory_space<vmem>>, vector<8x32xf32>
    tpu.vector_store %arg11[%c0_17, %c0_18], %20 {strides = array<i32>} : memref<8x32xf32, #tpu.memory_space<vmem>>, vector<8x32xf32>,
    %c0_19 = arith.constant 0 : index
    %c0_20 = arith.constant 0 : index
    %22 = vector.load %arg9[%c0_19, %c0_20] : memref<8x32xf32, #tpu.memory_space<vmem>>, vector<8x8xf32>
    %c0_21 = arith.constant 0 : index
    %c0_22 = arith.constant 0 : index
    %23 = vector.load %arg10[%c0_21, %c0_22] : memref<8x32xf32, #tpu.memory_space<vmem>>, vector<8x8xf32>
    %c0_23 = arith.constant 0 : index
    %c0_24 = arith.constant 0 : index
    %24 = vector.load %arg11[%c0_23, %c0_24] : memref<8x32xf32, #tpu.memory_space<vmem>>, vector<8x8xf32>
    %cst_25 = arith.constant dense<0.000000e+00> : vector<8x8xf32>
    %25 = tpu.matmul %22, %23, %cst_25 {dimension_numbers = #tpu.dot_dimension_numbers<[1], [1], [0], [0], [0, 0, 1, 0], [], []>} : vector<8x8xf32>, vector<8x8xf32>, vector<8x8xf32> -> vector<8x8xf32>
    %cst_26 = arith.constant dense<0xFF800000> : vector<8xf32>
    %26 = vector.multi_reduction <maximumf>, %25, %cst_26 [1] : vector<8x8xf32> to vector<8xf32>
    %27 = vector.shape_cast %26 : vector<8xf32> to vector<8x1xf32>
    %28 = vector.broadcast %27 : vector<8x1xf32> to vector<8x8xf32>
    %29 = arith.subf %25, %28 : vector<8x8xf32>
    %30 = math.exp %29 : vector<8x8xf32>
    %cst_27 = arith.constant dense<0.000000e+00> : vector<8xf32>
    %31 = vector.multi_reduction <add>, %30, %cst_27 [1] : vector<8x8xf32> to vector<8xf32>
    %32 = vector.shape_cast %31 : vector<8xf32> to vector<8x1xf32>
    %33 = tpu.reciprocal %32 {approx = true} : vector<8x1xf32> -> vector<8x1xf32>
    %34 = arith.mulf %32, %33 : vector<8x1xf32>
    %cst_28 = arith.constant 2.000000e+00 : f32
    %35 = vector.broadcast %cst_28 : f32 to vector<8x1xf32>
    %36 = arith.subf %35, %34 : vector<8x1xf32>
    %37 = arith.mulf %33, %36 : vector<8x1xf32>
    %38 = vector.broadcast %37 : vector<8x1xf32> to vector<8x8xf32>
    %39 = arith.mulf %30, %38 : vector<8x8xf32>
    %cst_29 = arith.constant dense<0.000000e+00> : vector<8x8xf32>
    %40 = tpu.matmul %39, %24, %cst_29 {dimension_numbers = #tpu.dot_dimension_numbers<[1], [0], [0], [1], [0, 0, 1, 1], [], []>} : vector<8x8xf32>, vector<8x8xf32>, vector<8x8xf32> -> vector<8x8xf32>
    %c0_30 = arith.constant 0 : index
    %c0_31 = arith.constant 0 : index
    %41 = vector.load %arg12[%c0_30, %c0_31] : memref<8x32xf32, #tpu.memory_space<vmem>>, vector<8x8xf32>
    tpu.vector_store %arg12[%c0_30, %c0_31], %40 {strides = array<i32>} : memref<8x32xf32, #tpu.memory_space<vmem>>, vector<8x8xf32>,
    %c0_32 = arith.constant 0 : index
    %c8 = arith.constant 8 : index
    %42 = vector.load %arg9[%c0_32, %c8] : memref<8x32xf32, #tpu.memory_space<vmem>>, vector<8x8xf32>
    %c0_33 = arith.constant 0 : index
    %c8_34 = arith.constant 8 : index
    %43 = vector.load %arg10[%c0_33, %c8_34] : memref<8x32xf32, #tpu.memory_space<vmem>>, vector<8x8xf32>
    %c0_35 = arith.constant 0 : index
    %c8_36 = arith.constant 8 : index
    %44 = vector.load %arg11[%c0_35, %c8_36] : memref<8x32xf32, #tpu.memory_space<vmem>>, vector<8x8xf32>
    %cst_37 = arith.constant dense<0.000000e+00> : vector<8x8xf32>
    %45 = tpu.matmul %42, %43, %cst_37 {dimension_numbers = #tpu.dot_dimension_numbers<[1], [1], [0], [0], [0, 0, 1, 0], [], []>} : vector<8x8xf32>, vector<8x8xf32>, vector<8x8xf32> -> vector<8x8xf32>
    %cst_38 = arith.constant dense<0xFF800000> : vector<8xf32>
    %46 = vector.multi_reduction <maximumf>, %45, %cst_38 [1] : vector<8x8xf32> to vector<8xf32>
    %47 = vector.shape_cast %46 : vector<8xf32> to vector<8x1xf32>
    %48 = vector.broadcast %47 : vector<8x1xf32> to vector<8x8xf32>
    %49 = arith.subf %45, %48 : vector<8x8xf32>
    %50 = math.exp %49 : vector<8x8xf32>
    %cst_39 = arith.constant dense<0.000000e+00> : vector<8xf32>
    %51 = vector.multi_reduction <add>, %50, %cst_39 [1] : vector<8x8xf32> to vector<8xf32>
    %52 = vector.shape_cast %51 : vector<8xf32> to vector<8x1xf32>
    %53 = tpu.reciprocal %52 {approx = true} : vector<8x1xf32> -> vector<8x1xf32>
    %54 = arith.mulf %52, %53 : vector<8x1xf32>
    %cst_40 = arith.constant 2.000000e+00 : f32
    %55 = vector.broadcast %cst_40 : f32 to vector<8x1xf32>
    %56 = arith.subf %55, %54 : vector<8x1xf32>
    %57 = arith.mulf %53, %56 : vector<8x1xf32>
    %58 = vector.broadcast %57 : vector<8x1xf32> to vector<8x8xf32>
    %59 = arith.mulf %50, %58 : vector<8x8xf32>
    %cst_41 = arith.constant dense<0.000000e+00> : vector<8x8xf32>
    %60 = tpu.matmul %59, %44, %cst_41 {dimension_numbers = #tpu.dot_dimension_numbers<[1], [0], [0], [1], [0, 0, 1, 1], [], []>} : vector<8x8xf32>, vector<8x8xf32>, vector<8x8xf32> -> vector<8x8xf32>
    %c0_42 = arith.constant 0 : index
    %c8_43 = arith.constant 8 : index
    %61 = vector.load %arg12[%c0_42, %c8_43] : memref<8x32xf32, #tpu.memory_space<vmem>>, vector<8x8xf32>
    tpu.vector_store %arg12[%c0_42, %c8_43], %60 {strides = array<i32>} : memref<8x32xf32, #tpu.memory_space<vmem>>, vector<8x8xf32>,
    %c0_44 = arith.constant 0 : index
    %c16 = arith.constant 16 : index
    %62 = vector.load %arg9[%c0_44, %c16] : memref<8x32xf32, #tpu.memory_space<vmem>>, vector<8x8xf32>
    %c0_45 = arith.constant 0 : index
    %c16_46 = arith.constant 16 : index
    %63 = vector.load %arg10[%c0_45, %c16_46] : memref<8x32xf32, #tpu.memory_space<vmem>>, vector<8x8xf32>
    %c0_47 = arith.constant 0 : index
    %c16_48 = arith.constant 16 : index
    %64 = vector.load %arg11[%c0_47, %c16_48] : memref<8x32xf32, #tpu.memory_space<vmem>>, vector<8x8xf32>
    %cst_49 = arith.constant dense<0.000000e+00> : vector<8x8xf32>
    %65 = tpu.matmul %62, %63, %cst_49 {dimension_numbers = #tpu.dot_dimension_numbers<[1], [1], [0], [0], [0, 0, 1, 0], [], []>} : vector<8x8xf32>, vector<8x8xf32>, vector<8x8xf32> -> vector<8x8xf32>
    %cst_50 = arith.constant dense<0xFF800000> : vector<8xf32>
    %66 = vector.multi_reduction <maximumf>, %65, %cst_50 [1] : vector<8x8xf32> to vector<8xf32>
    %67 = vector.shape_cast %66 : vector<8xf32> to vector<8x1xf32>
    %68 = vector.broadcast %67 : vector<8x1xf32> to vector<8x8xf32>
    %69 = arith.subf %65, %68 : vector<8x8xf32>
    %70 = math.exp %69 : vector<8x8xf32>
    %cst_51 = arith.constant dense<0.000000e+00> : vector<8xf32>
    %71 = vector.multi_reduction <add>, %70, %cst_51 [1] : vector<8x8xf32> to vector<8xf32>
    %72 = vector.shape_cast %71 : vector<8xf32> to vector<8x1xf32>
    %73 = tpu.reciprocal %72 {approx = true} : vector<8x1xf32> -> vector<8x1xf32>
    %74 = arith.mulf %72, %73 : vector<8x1xf32>
    %cst_52 = arith.constant 2.000000e+00 : f32
    %75 = vector.broadcast %cst_52 : f32 to vector<8x1xf32>
    %76 = arith.subf %75, %74 : vector<8x1xf32>
    %77 = arith.mulf %73, %76 : vector<8x1xf32>
    %78 = vector.broadcast %77 : vector<8x1xf32> to vector<8x8xf32>
    %79 = arith.mulf %70, %78 : vector<8x8xf32>
    %cst_53 = arith.constant dense<0.000000e+00> : vector<8x8xf32>
    %80 = tpu.matmul %79, %64, %cst_53 {dimension_numbers = #tpu.dot_dimension_numbers<[1], [0], [0], [1], [0, 0, 1, 1], [], []>} : vector<8x8xf32>, vector<8x8xf32>, vector<8x8xf32> -> vector<8x8xf32>
    %c0_54 = arith.constant 0 : index
    %c16_55 = arith.constant 16 : index
    %81 = vector.load %arg12[%c0_54, %c16_55] : memref<8x32xf32, #tpu.memory_space<vmem>>, vector<8x8xf32>
    tpu.vector_store %arg12[%c0_54, %c16_55], %80 {strides = array<i32>} : memref<8x32xf32, #tpu.memory_space<vmem>>, vector<8x8xf32>,
    %c0_56 = arith.constant 0 : index
    %c24 = arith.constant 24 : index
    %82 = vector.load %arg9[%c0_56, %c24] : memref<8x32xf32, #tpu.memory_space<vmem>>, vector<8x8xf32>
    %c0_57 = arith.constant 0 : index
    %c24_58 = arith.constant 24 : index
    %83 = vector.load %arg10[%c0_57, %c24_58] : memref<8x32xf32, #tpu.memory_space<vmem>>, vector<8x8xf32>
    %c0_59 = arith.constant 0 : index
    %c24_60 = arith.constant 24 : index
    %84 = vector.load %arg11[%c0_59, %c24_60] : memref<8x32xf32, #tpu.memory_space<vmem>>, vector<8x8xf32>
    %cst_61 = arith.constant dense<0.000000e+00> : vector<8x8xf32>
    %85 = tpu.matmul %82, %83, %cst_61 {dimension_numbers = #tpu.dot_dimension_numbers<[1], [1], [0], [0], [0, 0, 1, 0], [], []>} : vector<8x8xf32>, vector<8x8xf32>, vector<8x8xf32> -> vector<8x8xf32>
    %cst_62 = arith.constant dense<0xFF800000> : vector<8xf32>
    %86 = vector.multi_reduction <maximumf>, %85, %cst_62 [1] : vector<8x8xf32> to vector<8xf32>
    %87 = vector.shape_cast %86 : vector<8xf32> to vector<8x1xf32>
    %88 = vector.broadcast %87 : vector<8x1xf32> to vector<8x8xf32>
    %89 = arith.subf %85, %88 : vector<8x8xf32>
    %90 = math.exp %89 : vector<8x8xf32>
    %cst_63 = arith.constant dense<0.000000e+00> : vector<8xf32>
    %91 = vector.multi_reduction <add>, %90, %cst_63 [1] : vector<8x8xf32> to vector<8xf32>
    %92 = vector.shape_cast %91 : vector<8xf32> to vector<8x1xf32>
    %93 = tpu.reciprocal %92 {approx = true} : vector<8x1xf32> -> vector<8x1xf32>
    %94 = arith.mulf %92, %93 : vector<8x1xf32>
    %cst_64 = arith.constant 2.000000e+00 : f32
    %95 = vector.broadcast %cst_64 : f32 to vector<8x1xf32>
    %96 = arith.subf %95, %94 : vector<8x1xf32>
    %97 = arith.mulf %93, %96 : vector<8x1xf32>
    %98 = vector.broadcast %97 : vector<8x1xf32> to vector<8x8xf32>
    %99 = arith.mulf %90, %98 : vector<8x8xf32>
    %cst_65 = arith.constant dense<0.000000e+00> : vector<8x8xf32>
    %100 = tpu.matmul %99, %84, %cst_65 {dimension_numbers = #tpu.dot_dimension_numbers<[1], [0], [0], [1], [0, 0, 1, 1], [], []>} : vector<8x8xf32>, vector<8x8xf32>, vector<8x8xf32> -> vector<8x8xf32>
    %c0_66 = arith.constant 0 : index
    %c24_67 = arith.constant 24 : index
    %101 = vector.load %arg12[%c0_66, %c24_67] : memref<8x32xf32, #tpu.memory_space<vmem>>, vector<8x8xf32>
    tpu.vector_store %arg12[%c0_66, %c24_67], %100 {strides = array<i32>} : memref<8x32xf32, #tpu.memory_space<vmem>>, vector<8x8xf32>,
    %c0_68 = arith.constant 0 : index
    %c0_69 = arith.constant 0 : index
    %102 = vector.load %arg12[%c0_68, %c0_69] : memref<8x32xf32, #tpu.memory_space<vmem>>, vector<8x32xf32>
    %c0_70 = arith.constant 0 : index
    %c0_71 = arith.constant 0 : index
    %103 = vector.load %arg6[%c0_70, %c0_71] : memref<32x32xf32, #tpu.memory_space<vmem>>, vector<32x32xf32>
    %cst_72 = arith.constant dense<0.000000e+00> : vector<8x32xf32>
    %104 = tpu.matmul %102, %103, %cst_72 {dimension_numbers = #tpu.dot_dimension_numbers<[1], [0], [0], [1], [0, 0, 1, 1], [], []>} : vector<8x32xf32>, vector<32x32xf32>, vector<8x32xf32> -> vector<8x32xf32>
    %c0_73 = arith.constant 0 : index
    %c0_74 = arith.constant 0 : index
    %105 = vector.load %arg7[%c0_73, %c0_74] : memref<1x32xf32, #tpu.memory_space<vmem>>, vector<1x32xf32>
    %106 = vector.broadcast %105 : vector<1x32xf32> to vector<8x32xf32>
    %107 = arith.addf %104, %106 : vector<8x32xf32>
    %c0_75 = arith.constant 0 : index
    %c0_76 = arith.constant 0 : index
    %108 = vector.load %arg8[%c0_75, %c0_76] : memref<8x32xf32, #tpu.memory_space<vmem>>, vector<8x32xf32>
    tpu.vector_store %arg8[%c0_75, %c0_76], %107 {strides = array<i32>} : memref<8x32xf32, #tpu.memory_space<vmem>>, vector<8x32xf32>,
    return
  }
  func.func @transform_0(%arg0: i32) -> (i32, i32) {
    %c0_i32 = arith.constant 0 : i32
    %c0_i32_0 = arith.constant 0 : i32
    return %arg0, %c0_i32 : i32, i32
  }
  func.func @transform_1(%arg0: i32) -> (i32, i32) {
    %c0_i32 = arith.constant 0 : i32
    %c0_i32_0 = arith.constant 0 : i32
    return %arg0, %c0_i32 : i32, i32
  }
  func.func @transform_2(%arg0: i32) -> (i32, i32) {
    %c0_i32 = arith.constant 0 : i32
    %c0_i32_0 = arith.constant 0 : i32
    return %arg0, %c0_i32 : i32, i32
  }
  func.func @transform_3(%arg0: i32) -> (i32, i32) {
    %c0_i32 = arith.constant 0 : i32
    %c0_i32_0 = arith.constant 0 : i32
    %c0_i32_1 = arith.constant 0 : i32
    return %c0_i32, %c0_i32_0 : i32, i32
  }
  func.func @transform_4(%arg0: i32) -> (i32, i32) {
    %c0_i32 = arith.constant 0 : i32
    %c0_i32_0 = arith.constant 0 : i32
    %c0_i32_1 = arith.constant 0 : i32
    return %c0_i32, %c0_i32_0 : i32, i32
  }
  func.func @transform_5(%arg0: i32) -> (i32, i32) {
    %c0_i32 = arith.constant 0 : i32
    %c0_i32_0 = arith.constant 0 : i32
    %c0_i32_1 = arith.constant 0 : i32
    return %c0_i32, %c0_i32_0 : i32, i32
  }
  func.func @transform_6(%arg0: i32) -> (i32, i32) {
    %c0_i32 = arith.constant 0 : i32
    %c0_i32_0 = arith.constant 0 : i32
    %c0_i32_1 = arith.constant 0 : i32
    return %c0_i32, %c0_i32_0 : i32, i32
  }
  func.func @transform_7(%arg0: i32) -> (i32, i32) {
    %c0_i32 = arith.constant 0 : i32
    %c0_i32_0 = arith.constant 0 : i32
    return %arg0, %c0_i32 : i32, i32
  }
}

module attributes {stable_mosaic.version = 11 : i64} {
  func.func @_mha_cross_kernel(%arg0: i32, %arg1: memref<8x32xf32, #tpu.memory_space<vmem>>, %arg2: memref<8x32xf32, #tpu.memory_space<vmem>>, %arg3: memref<8x32xf32, #tpu.memory_space<vmem>>, %arg4: memref<32x96xf32, #tpu.memory_space<vmem>>, %arg5: memref<1x96xf32, #tpu.memory_space<vmem>>, %arg6: memref<32x32xf32, #tpu.memory_space<vmem>>, %arg7: memref<1x32xf32, #tpu.memory_space<vmem>>, %arg8: memref<8x32xf32, #tpu.memory_space<vmem>>, %arg9: memref<8x32xf32, #tpu.memory_space<vmem>>, %arg10: memref<8x32xf32, #tpu.memory_space<vmem>>, %arg11: memref<8x32xf32, #tpu.memory_space<vmem>>, %arg12: memref<8x32xf32, #tpu.memory_space<vmem>>) attributes {dimension_semantics = [#tpu.dimension_semantics<parallel>], iteration_bounds = array<i64: 2>, scalar_prefetch = 0 : i64, scratch_operands = 4 : i64, tpu.core_type = #tpu.core_type<tc>, window_params = [{transform_indices = @transform_0, window_bounds = array<i64: 8, 32>}, {transform_indices = @transform_1, window_bounds = array<i64: 8, 32>}, {transform_indices = @transform_2, window_bounds = array<i64: 8, 32>}, {pipeline_mode = #tpu.pipeline_mode<synchronous>, transform_indices = @transform_3, window_bounds = array<i64: 32, 96>}, {pipeline_mode = #tpu.pipeline_mode<synchronous>, transform_indices = @transform_4, window_bounds = array<i64: 1, 96>}, {pipeline_mode = #tpu.pipeline_mode<synchronous>, transform_indices = @transform_5, window_bounds = array<i64: 32, 32>}, {pipeline_mode = #tpu.pipeline_mode<synchronous>, transform_indices = @transform_6, window_bounds = array<i64: 1, 32>}, {transform_indices = @transform_7, window_bounds = array<i64: 8, 32>}]} {
    %c0 = arith.constant 0 : index
    %c0_0 = arith.constant 0 : index
    %0 = vector.load %arg5[%c0, %c0_0] : memref<1x96xf32, #tpu.memory_space<vmem>>, vector<1x96xf32>
    %c0_1 = arith.constant 0 : index
    %c0_2 = arith.constant 0 : index
    %1 = vector.load %arg1[%c0_1, %c0_2] : memref<8x32xf32, #tpu.memory_space<vmem>>, vector<8x32xf32>
    %c0_3 = arith.constant 0 : index
    %c0_4 = arith.constant 0 : index
    %2 = vector.load %arg4[%c0_3, %c0_4] : memref<32x96xf32, #tpu.memory_space<vmem>>, vector<32x32xf32>
    %cst = arith.constant dense<0.000000e+00> : vector<8x32xf32>
    %3 = tpu.matmul %1, %2, %cst {dimension_numbers = #tpu.dot_dimension_numbers<[1], [0], [0], [1], [0, 0, 1, 1], [], []>} : vector<8x32xf32>, vector<32x32xf32>, vector<8x32xf32> -> vector<8x32xf32>
    %4 = vector.extract_strided_slice %0 {offsets = [0, 0], sizes = [1, 32], strides = [1, 1]} : vector<1x96xf32> to vector<1x32xf32>
    %5 = vector.broadcast %4 : vector<1x32xf32> to vector<8x32xf32>
    %6 = arith.addf %3, %5 : vector<8x32xf32>
    %c0_5 = arith.constant 0 : index
    %c0_6 = arith.constant 0 : index
    %7 = vector.load %arg9[%c0_5, %c0_6] : memref<8x32xf32, #tpu.memory_space<vmem>>, vector<8x32xf32>
    tpu.vector_store %arg9[%c0_5, %c0_6], %6 {strides = array<i32>} : memref<8x32xf32, #tpu.memory_space<vmem>>, vector<8x32xf32>,
    %c0_7 = arith.constant 0 : index
    %c0_8 = arith.constant 0 : index
    %8 = vector.load %arg2[%c0_7, %c0_8] : memref<8x32xf32, #tpu.memory_space<vmem>>, vector<8x32xf32>
    %c0_9 = arith.constant 0 : index
    %c32 = arith.constant 32 : index
    %9 = vector.load %arg4[%c0_9, %c32] : memref<32x96xf32, #tpu.memory_space<vmem>>, vector<32x32xf32>
    %cst_10 = arith.constant dense<0.000000e+00> : vector<8x32xf32>
    %10 = tpu.matmul %8, %9, %cst_10 {dimension_numbers = #tpu.dot_dimension_numbers<[1], [0], [0], [1], [0, 0, 1, 1], [], []>} : vector<8x32xf32>, vector<32x32xf32>, vector<8x32xf32> -> vector<8x32xf32>
    %11 = vector.extract_strided_slice %0 {offsets = [0, 32], sizes = [1, 32], strides = [1, 1]} : vector<1x96xf32> to vector<1x32xf32>
    %12 = vector.broadcast %11 : vector<1x32xf32> to vector<8x32xf32>
    %13 = arith.addf %10, %12 : vector<8x32xf32>
    %c0_11 = arith.constant 0 : index
    %c0_12 = arith.constant 0 : index
    %14 = vector.load %arg10[%c0_11, %c0_12] : memref<8x32xf32, #tpu.memory_space<vmem>>, vector<8x32xf32>
    tpu.vector_store %arg10[%c0_11, %c0_12], %13 {strides = array<i32>} : memref<8x32xf32, #tpu.memory_space<vmem>>, vector<8x32xf32>,
    %c0_13 = arith.constant 0 : index
    %c0_14 = arith.constant 0 : index
    %15 = vector.load %arg3[%c0_13, %c0_14] : memref<8x32xf32, #tpu.memory_space<vmem>>, vector<8x32xf32>
    %c0_15 = arith.constant 0 : index
    %c64 = arith.constant 64 : index
    %16 = vector.load %arg4[%c0_15, %c64] : memref<32x96xf32, #tpu.memory_space<vmem>>, vector<32x32xf32>
    %cst_16 = arith.constant dense<0.000000e+00> : vector<8x32xf32>
    %17 = tpu.matmul %15, %16, %cst_16 {dimension_numbers = #tpu.dot_dimension_numbers<[1], [0], [0], [1], [0, 0, 1, 1], [], []>} : vector<8x32xf32>, vector<32x32xf32>, vector<8x32xf32> -> vector<8x32xf32>
    %18 = vector.extract_strided_slice %0 {offsets = [0, 64], sizes = [1, 32], strides = [1, 1]} : vector<1x96xf32> to vector<1x32xf32>
    %19 = vector.broadcast %18 : vector<1x32xf32> to vector<8x32xf32>
    %20 = arith.addf %17, %19 : vector<8x32xf32>
    %c0_17 = arith.constant 0 : index
    %c0_18 = arith.constant 0 : index
    %21 = vector.load %arg11[%c0_17, %c0_18] : memref<8x32xf32, #tpu.memory_space<vmem>>, vector<8x32xf32>
    tpu.vector_store %arg11[%c0_17, %c0_18], %20 {strides = array<i32>} : memref<8x32xf32, #tpu.memory_space<vmem>>, vector<8x32xf32>,
    %c0_19 = arith.constant 0 : index
    %c0_20 = arith.constant 0 : index
    %22 = vector.load %arg9[%c0_19, %c0_20] : memref<8x32xf32, #tpu.memory_space<vmem>>, vector<8x8xf32>
    %c0_21 = arith.constant 0 : index
    %c0_22 = arith.constant 0 : index
    %23 = vector.load %arg10[%c0_21, %c0_22] : memref<8x32xf32, #tpu.memory_space<vmem>>, vector<8x8xf32>
    %c0_23 = arith.constant 0 : index
    %c0_24 = arith.constant 0 : index
    %24 = vector.load %arg11[%c0_23, %c0_24] : memref<8x32xf32, #tpu.memory_space<vmem>>, vector<8x8xf32>
    %cst_25 = arith.constant dense<0.000000e+00> : vector<8x8xf32>
    %25 = tpu.matmul %22, %23, %cst_25 {dimension_numbers = #tpu.dot_dimension_numbers<[1], [1], [0], [0], [0, 0, 1, 0], [], []>} : vector<8x8xf32>, vector<8x8xf32>, vector<8x8xf32> -> vector<8x8xf32>
    %cst_26 = arith.constant dense<0xFF800000> : vector<8xf32>
    %26 = vector.multi_reduction <maximumf>, %25, %cst_26 [1] : vector<8x8xf32> to vector<8xf32>
    %27 = vector.shape_cast %26 : vector<8xf32> to vector<8x1xf32>
    %28 = vector.broadcast %27 : vector<8x1xf32> to vector<8x8xf32>
    %29 = arith.subf %25, %28 : vector<8x8xf32>
    %30 = math.exp %29 : vector<8x8xf32>
    %cst_27 = arith.constant dense<0.000000e+00> : vector<8xf32>
    %31 = vector.multi_reduction <add>, %30, %cst_27 [1] : vector<8x8xf32> to vector<8xf32>
    %32 = vector.shape_cast %31 : vector<8xf32> to vector<8x1xf32>
    %33 = tpu.reciprocal %32 {approx = true} : vector<8x1xf32> -> vector<8x1xf32>
    %34 = arith.mulf %32, %33 : vector<8x1xf32>
    %cst_28 = arith.constant 2.000000e+00 : f32
    %35 = vector.broadcast %cst_28 : f32 to vector<8x1xf32>
    %36 = arith.subf %35, %34 : vector<8x1xf32>
    %37 = arith.mulf %33, %36 : vector<8x1xf32>
    %38 = vector.broadcast %37 : vector<8x1xf32> to vector<8x8xf32>
    %39 = arith.mulf %30, %38 : vector<8x8xf32>
    %cst_29 = arith.constant dense<0.000000e+00> : vector<8x8xf32>
    %40 = tpu.matmul %39, %24, %cst_29 {dimension_numbers = #tpu.dot_dimension_numbers<[1], [0], [0], [1], [0, 0, 1, 1], [], []>} : vector<8x8xf32>, vector<8x8xf32>, vector<8x8xf32> -> vector<8x8xf32>
    %c0_30 = arith.constant 0 : index
    %c0_31 = arith.constant 0 : index
    %41 = vector.load %arg12[%c0_30, %c0_31] : memref<8x32xf32, #tpu.memory_space<vmem>>, vector<8x8xf32>
    tpu.vector_store %arg12[%c0_30, %c0_31], %40 {strides = array<i32>} : memref<8x32xf32, #tpu.memory_space<vmem>>, vector<8x8xf32>,
    %c0_32 = arith.constant 0 : index
    %c8 = arith.constant 8 : index
    %42 = vector.load %arg9[%c0_32, %c8] : memref<8x32xf32, #tpu.memory_space<vmem>>, vector<8x8xf32>
    %c0_33 = arith.constant 0 : index
    %c8_34 = arith.constant 8 : index
    %43 = vector.load %arg10[%c0_33, %c8_34] : memref<8x32xf32, #tpu.memory_space<vmem>>, vector<8x8xf32>
    %c0_35 = arith.constant 0 : index
    %c8_36 = arith.constant 8 : index
    %44 = vector.load %arg11[%c0_35, %c8_36] : memref<8x32xf32, #tpu.memory_space<vmem>>, vector<8x8xf32>
    %cst_37 = arith.constant dense<0.000000e+00> : vector<8x8xf32>
    %45 = tpu.matmul %42, %43, %cst_37 {dimension_numbers = #tpu.dot_dimension_numbers<[1], [1], [0], [0], [0, 0, 1, 0], [], []>} : vector<8x8xf32>, vector<8x8xf32>, vector<8x8xf32> -> vector<8x8xf32>
    %cst_38 = arith.constant dense<0xFF800000> : vector<8xf32>
    %46 = vector.multi_reduction <maximumf>, %45, %cst_38 [1] : vector<8x8xf32> to vector<8xf32>
    %47 = vector.shape_cast %46 : vector<8xf32> to vector<8x1xf32>
    %48 = vector.broadcast %47 : vector<8x1xf32> to vector<8x8xf32>
    %49 = arith.subf %45, %48 : vector<8x8xf32>
    %50 = math.exp %49 : vector<8x8xf32>
    %cst_39 = arith.constant dense<0.000000e+00> : vector<8xf32>
    %51 = vector.multi_reduction <add>, %50, %cst_39 [1] : vector<8x8xf32> to vector<8xf32>
    %52 = vector.shape_cast %51 : vector<8xf32> to vector<8x1xf32>
    %53 = tpu.reciprocal %52 {approx = true} : vector<8x1xf32> -> vector<8x1xf32>
    %54 = arith.mulf %52, %53 : vector<8x1xf32>
    %cst_40 = arith.constant 2.000000e+00 : f32
    %55 = vector.broadcast %cst_40 : f32 to vector<8x1xf32>
    %56 = arith.subf %55, %54 : vector<8x1xf32>
    %57 = arith.mulf %53, %56 : vector<8x1xf32>
    %58 = vector.broadcast %57 : vector<8x1xf32> to vector<8x8xf32>
    %59 = arith.mulf %50, %58 : vector<8x8xf32>
    %cst_41 = arith.constant dense<0.000000e+00> : vector<8x8xf32>
    %60 = tpu.matmul %59, %44, %cst_41 {dimension_numbers = #tpu.dot_dimension_numbers<[1], [0], [0], [1], [0, 0, 1, 1], [], []>} : vector<8x8xf32>, vector<8x8xf32>, vector<8x8xf32> -> vector<8x8xf32>
    %c0_42 = arith.constant 0 : index
    %c8_43 = arith.constant 8 : index
    %61 = vector.load %arg12[%c0_42, %c8_43] : memref<8x32xf32, #tpu.memory_space<vmem>>, vector<8x8xf32>
    tpu.vector_store %arg12[%c0_42, %c8_43], %60 {strides = array<i32>} : memref<8x32xf32, #tpu.memory_space<vmem>>, vector<8x8xf32>,
    %c0_44 = arith.constant 0 : index
    %c16 = arith.constant 16 : index
    %62 = vector.load %arg9[%c0_44, %c16] : memref<8x32xf32, #tpu.memory_space<vmem>>, vector<8x8xf32>
    %c0_45 = arith.constant 0 : index
    %c16_46 = arith.constant 16 : index
    %63 = vector.load %arg10[%c0_45, %c16_46] : memref<8x32xf32, #tpu.memory_space<vmem>>, vector<8x8xf32>
    %c0_47 = arith.constant 0 : index
    %c16_48 = arith.constant 16 : index
    %64 = vector.load %arg11[%c0_47, %c16_48] : memref<8x32xf32, #tpu.memory_space<vmem>>, vector<8x8xf32>
    %cst_49 = arith.constant dense<0.000000e+00> : vector<8x8xf32>
    %65 = tpu.matmul %62, %63, %cst_49 {dimension_numbers = #tpu.dot_dimension_numbers<[1], [1], [0], [0], [0, 0, 1, 0], [], []>} : vector<8x8xf32>, vector<8x8xf32>, vector<8x8xf32> -> vector<8x8xf32>
    %cst_50 = arith.constant dense<0xFF800000> : vector<8xf32>
    %66 = vector.multi_reduction <maximumf>, %65, %cst_50 [1] : vector<8x8xf32> to vector<8xf32>
    %67 = vector.shape_cast %66 : vector<8xf32> to vector<8x1xf32>
    %68 = vector.broadcast %67 : vector<8x1xf32> to vector<8x8xf32>
    %69 = arith.subf %65, %68 : vector<8x8xf32>
    %70 = math.exp %69 : vector<8x8xf32>
    %cst_51 = arith.constant dense<0.000000e+00> : vector<8xf32>
    %71 = vector.multi_reduction <add>, %70, %cst_51 [1] : vector<8x8xf32> to vector<8xf32>
    %72 = vector.shape_cast %71 : vector<8xf32> to vector<8x1xf32>
    %73 = tpu.reciprocal %72 {approx = true} : vector<8x1xf32> -> vector<8x1xf32>
    %74 = arith.mulf %72, %73 : vector<8x1xf32>
    %cst_52 = arith.constant 2.000000e+00 : f32
    %75 = vector.broadcast %cst_52 : f32 to vector<8x1xf32>
    %76 = arith.subf %75, %74 : vector<8x1xf32>
    %77 = arith.mulf %73, %76 : vector<8x1xf32>
    %78 = vector.broadcast %77 : vector<8x1xf32> to vector<8x8xf32>
    %79 = arith.mulf %70, %78 : vector<8x8xf32>
    %cst_53 = arith.constant dense<0.000000e+00> : vector<8x8xf32>
    %80 = tpu.matmul %79, %64, %cst_53 {dimension_numbers = #tpu.dot_dimension_numbers<[1], [0], [0], [1], [0, 0, 1, 1], [], []>} : vector<8x8xf32>, vector<8x8xf32>, vector<8x8xf32> -> vector<8x8xf32>
    %c0_54 = arith.constant 0 : index
    %c16_55 = arith.constant 16 : index
    %81 = vector.load %arg12[%c0_54, %c16_55] : memref<8x32xf32, #tpu.memory_space<vmem>>, vector<8x8xf32>
    tpu.vector_store %arg12[%c0_54, %c16_55], %80 {strides = array<i32>} : memref<8x32xf32, #tpu.memory_space<vmem>>, vector<8x8xf32>,
    %c0_56 = arith.constant 0 : index
    %c24 = arith.constant 24 : index
    %82 = vector.load %arg9[%c0_56, %c24] : memref<8x32xf32, #tpu.memory_space<vmem>>, vector<8x8xf32>
    %c0_57 = arith.constant 0 : index
    %c24_58 = arith.constant 24 : index
    %83 = vector.load %arg10[%c0_57, %c24_58] : memref<8x32xf32, #tpu.memory_space<vmem>>, vector<8x8xf32>
    %c0_59 = arith.constant 0 : index
    %c24_60 = arith.constant 24 : index
    %84 = vector.load %arg11[%c0_59, %c24_60] : memref<8x32xf32, #tpu.memory_space<vmem>>, vector<8x8xf32>
    %cst_61 = arith.constant dense<0.000000e+00> : vector<8x8xf32>
    %85 = tpu.matmul %82, %83, %cst_61 {dimension_numbers = #tpu.dot_dimension_numbers<[1], [1], [0], [0], [0, 0, 1, 0], [], []>} : vector<8x8xf32>, vector<8x8xf32>, vector<8x8xf32> -> vector<8x8xf32>
    %cst_62 = arith.constant dense<0xFF800000> : vector<8xf32>
    %86 = vector.multi_reduction <maximumf>, %85, %cst_62 [1] : vector<8x8xf32> to vector<8xf32>
    %87 = vector.shape_cast %86 : vector<8xf32> to vector<8x1xf32>
    %88 = vector.broadcast %87 : vector<8x1xf32> to vector<8x8xf32>
    %89 = arith.subf %85, %88 : vector<8x8xf32>
    %90 = math.exp %89 : vector<8x8xf32>
    %cst_63 = arith.constant dense<0.000000e+00> : vector<8xf32>
    %91 = vector.multi_reduction <add>, %90, %cst_63 [1] : vector<8x8xf32> to vector<8xf32>
    %92 = vector.shape_cast %91 : vector<8xf32> to vector<8x1xf32>
    %93 = tpu.reciprocal %92 {approx = true} : vector<8x1xf32> -> vector<8x1xf32>
    %94 = arith.mulf %92, %93 : vector<8x1xf32>
    %cst_64 = arith.constant 2.000000e+00 : f32
    %95 = vector.broadcast %cst_64 : f32 to vector<8x1xf32>
    %96 = arith.subf %95, %94 : vector<8x1xf32>
    %97 = arith.mulf %93, %96 : vector<8x1xf32>
    %98 = vector.broadcast %97 : vector<8x1xf32> to vector<8x8xf32>
    %99 = arith.mulf %90, %98 : vector<8x8xf32>
    %cst_65 = arith.constant dense<0.000000e+00> : vector<8x8xf32>
    %100 = tpu.matmul %99, %84, %cst_65 {dimension_numbers = #tpu.dot_dimension_numbers<[1], [0], [0], [1], [0, 0, 1, 1], [], []>} : vector<8x8xf32>, vector<8x8xf32>, vector<8x8xf32> -> vector<8x8xf32>
    %c0_66 = arith.constant 0 : index
    %c24_67 = arith.constant 24 : index
    %101 = vector.load %arg12[%c0_66, %c24_67] : memref<8x32xf32, #tpu.memory_space<vmem>>, vector<8x8xf32>
    tpu.vector_store %arg12[%c0_66, %c24_67], %100 {strides = array<i32>} : memref<8x32xf32, #tpu.memory_space<vmem>>, vector<8x8xf32>,
    %c0_68 = arith.constant 0 : index
    %c0_69 = arith.constant 0 : index
    %102 = vector.load %arg12[%c0_68, %c0_69] : memref<8x32xf32, #tpu.memory_space<vmem>>, vector<8x32xf32>
    %c0_70 = arith.constant 0 : index
    %c0_71 = arith.constant 0 : index
    %103 = vector.load %arg6[%c0_70, %c0_71] : memref<32x32xf32, #tpu.memory_space<vmem>>, vector<32x32xf32>
    %cst_72 = arith.constant dense<0.000000e+00> : vector<8x32xf32>
    %104 = tpu.matmul %102, %103, %cst_72 {dimension_numbers = #tpu.dot_dimension_numbers<[1], [0], [0], [1], [0, 0, 1, 1], [], []>} : vector<8x32xf32>, vector<32x32xf32>, vector<8x32xf32> -> vector<8x32xf32>
    %c0_73 = arith.constant 0 : index
    %c0_74 = arith.constant 0 : index
    %105 = vector.load %arg7[%c0_73, %c0_74] : memref<1x32xf32, #tpu.memory_space<vmem>>, vector<1x32xf32>
    %106 = vector.broadcast %105 : vector<1x32xf32> to vector<8x32xf32>
    %107 = arith.addf %104, %106 : vector<8x32xf32>
    %c0_75 = arith.constant 0 : index
    %c0_76 = arith.constant 0 : index
    %108 = vector.load %arg8[%c0_75, %c0_76] : memref<8x32xf32, #tpu.memory_space<vmem>>, vector<8x32xf32>
    tpu.vector_store %arg8[%c0_75, %c0_76], %107 {strides = array<i32>} : memref<8x32xf32, #tpu.memory_space<vmem>>, vector<8x32xf32>,
    return
  }
  func.func @transform_0(%arg0: i32) -> (i32, i32) {
    %c0_i32 = arith.constant 0 : i32
    %c0_i32_0 = arith.constant 0 : i32
    return %arg0, %c0_i32 : i32, i32
  }
  func.func @transform_1(%arg0: i32) -> (i32, i32) {
    %c0_i32 = arith.constant 0 : i32
    %c0_i32_0 = arith.constant 0 : i32
    return %arg0, %c0_i32 : i32, i32
  }
  func.func @transform_2(%arg0: i32) -> (i32, i32) {
    %c0_i32 = arith.constant 0 : i32
    %c0_i32_0 = arith.constant 0 : i32
    return %arg0, %c0_i32 : i32, i32
  }
  func.func @transform_3(%arg0: i32) -> (i32, i32) {
    %c0_i32 = arith.constant 0 : i32
    %c0_i32_0 = arith.constant 0 : i32
    %c0_i32_1 = arith.constant 0 : i32
    return %c0_i32, %c0_i32_0 : i32, i32
  }
  func.func @transform_4(%arg0: i32) -> (i32, i32) {
    %c0_i32 = arith.constant 0 : i32
    %c0_i32_0 = arith.constant 0 : i32
    %c0_i32_1 = arith.constant 0 : i32
    return %c0_i32, %c0_i32_0 : i32, i32
  }
  func.func @transform_5(%arg0: i32) -> (i32, i32) {
    %c0_i32 = arith.constant 0 : i32
    %c0_i32_0 = arith.constant 0 : i32
    %c0_i32_1 = arith.constant 0 : i32
    return %c0_i32, %c0_i32_0 : i32, i32
  }
  func.func @transform_6(%arg0: i32) -> (i32, i32) {
    %c0_i32 = arith.constant 0 : i32
    %c0_i32_0 = arith.constant 0 : i32
    %c0_i32_1 = arith.constant 0 : i32
    return %c0_i32, %c0_i32_0 : i32, i32
  }
  func.func @transform_7(%arg0: i32) -> (i32, i32) {
    %c0_i32 = arith.constant 0 : i32
    %c0_i32_0 = arith.constant 0 : i32
    return %arg0, %c0_i32 : i32, i32
  }
}

</mosaic_0001>

<bundles_post_ra>
// kernel: tpu_custom_call.1
= control target key start
LH: loop header
LB: loop body
LE: loop exit
PB: predicated region body
PF: predicated region fallthrough
CT: control target
= control target key end

     0   :  { %s2610_s0 = inlined_call_operand.hbm [shape: f32[16,32], index: 0, kind: input, shape index: {}]   ;;  %s2611_s1 = inlined_call_operand.hbm [shape: f32[16,32], index: 1, kind: input, shape index: {}]   ;;  %s2612_s2 = inlined_call_operand.hbm [shape: f32[16,32], index: 2, kind: input, shape index: {}]   ;;  %s2613_s3 = inlined_call_operand.hbm [shape: f32[32,96], index: 3, kind: input, shape index: {}]   ;;  %s2614_s4 = inlined_call_operand.vmem [shape: f32[1,96], index: 4, kind: input, shape index: {}]   ;;  %s2615_s5 = inlined_call_operand.hbm [shape: f32[32,32], index: 5, kind: input, shape index: {}]   ;;  %s2616_s6 = inlined_call_operand.vmem [shape: f32[1,32], index: 6, kind: input, shape index: {}]   ;;  %s2617_s7 = inlined_call_operand.hbm [shape: f32[16,32], index: 7, kind: output, shape index: {}]  }
   0x1   :  { %2635 = sst [smem:[#allocation23_spill]] %s2611_s1 }
   0x2   :  { %2636 = sst [smem:[#allocation24_spill]] %s2613_s3 }
   0x3   :  { %12 = vsyncpa [#allocation7], 0 }
   0x4   :  { %14 = vsyncpa [#allocation7 + $0x1], 0 }
   0x5   :  { %15 = vsyncpa [#allocation10], 0 }
   0x6   :  { %17 = vsyncpa [#allocation10 + $0x1], 0 }
   0x7   :  { %18 = vsyncpa [#allocation13], 0 }
   0x8   :  { %19 = vsyncpa [#allocation8], 0 }
   0x9   :  { %21 = vsyncpa [#allocation8 + $0x1], 0  ;;  %s2208_s24 = smov 0   ;;  %s2210_s25 = smov 0  }
   0xa   :  { %s2212_s26 = smov 0   ;;  %s2214_s27 = smov 0  }
   0xb LB: > { %2637 = sst [smem:[#allocation20_spill]] %s2147_s27  ;;  %s2229_s28 = sadd.s32 4294967295, %s2147_s27   ;;  %s2147_s27 = sphi %s2214_s27, %s2667_s27   ;;  %s2143_s26 = sphi %s2212_s26, %s2671_s26   ;;  %s2139_s25 = sphi %s2210_s25, %s2670_s25   ;;  %s2135_s24 = sphi %s2208_s24, %s2669_s24  }
   0xc   : > { %s1617_s29 = sadd.s32 4294967294, %s2147_s27   ;;  %p47_p0 = scmp.ne.s32.totalorder %s2139_s25, %s2135_s24 }
   0xd   : > { %p2618_p1 = scmp.eq.s32.totalorder %s2229_s28, 0  ;;  %p213_p3 = scmp.eq.s32.totalorder %s1617_s29, 1 }
   0xe   : > { %p1618_p5 = scmp.ge.s32.totalorder %s2147_s27, 1  ;;  %p220_p7 = scmp.lt.s32.totalorder %s2147_s27, 3 }
   0xf   : > { %p2238_p4 = por %p2618_p1, %p47_p0  ;;  %p2243_p6 = por %p213_p3, %p47_p0 }
  0x10   : > { %p2248_p8 = pnand %p1618_p5, %p220_p7  ;;  %s2149_s10 = smov [#allocation12]  }
  0x11   : > { %s2638_s30 = scalar_select %p2238_p4, 1, 0 }
  0x12   : > { %s2639_s8 = scalar_select %p2243_p6, 1, 0 }
  0x13   : > { %s2640_s9 = scalar_select %p2248_p8, 1, 0 }
  0x14   : > { %s232_s11 = sshll.u32 %s2149_s10, 4  ;;  %p1817_p9 = pneg %p2248_p8  ;;  %s2252_s11 = int_to_ptr.vmem [resolvable:$true] %s232_s11 }
  0x15   : > { %s2264_s13 = sadd.s32 1, %s2147_s27   ;;  %s34_s14 = sadd.s32 1, %s2143_s26 }
  0x16   : > { %p2259_p11 = pnand %p1817_p9, %p2618_p1  ;;  %2642 = sst [smem:[#allocation21_spill]] %s2264_s13 }
  0x17   : > { %s31_s15 = ssub.s32 %s2147_s27, %s2264_s13  ;;  %s2643_s3 = sld [smem:[#allocation24_spill]] }
  0x18   : > { %s2641_s12 = scalar_select %p2259_p11, 1, 0 }
  0x19   : > { %p2624_p13 = pneg %p2259_p11 }
  0x1d   : > { %s1927_s18 = scalar_lea.hbm %s2643_s3, 512 }
  0x1e   : > { %p1928_p12 = scmp.ne.s32.totalorder %s2643_s3, %s1927_s18  ;;  %p1934_p5 = scmp.lt.u32.totalorder %s1927_s18, %s2643_s3 }
  0x20   : > { %p1930_p0 = pnand %p2624_p13, %p1928_p12 }
  0x22   : > { %p1931_p3 = pneg %p1930_p0 }
  0x24   : > { %p1936_p7 = pnand %p1934_p5, %p1931_p3 }
  0x26   : > { %1939 = shalt.err (!%p1936_p7)
}
  0x27   : > { %s1940_s23 = scalar_lea.vmem %s2252_s11, 512  ;;  %p1948_p2 = scmp.lt.s32.totalorder %s2252_s11, %s2252_s11 }
  0x28   : > { %p1941_p9 = scmp.ne.s32.totalorder %s2252_s11, %s1940_s23  ;;  %p1949_p12 = scmp.lt.s32.totalorder %s1940_s23, %s1940_s23 }
  0x2a   : > { %p1943_p10 = pnand %p1941_p9, %p2624_p13  ;;  %p1950_p0 = por %p1949_p12, %p1948_p2 }
  0x2c   : > { %p1944_p1 = pneg %p1943_p10 }
  0x2e   : > { %p1951_p6 = pnand %p1950_p0, %p1944_p1 }
  0x30   : > { %1954 = shalt.err (!%p1951_p6)
}
  0x31   : > { %s2619_s29 = smov 128   ;;  %s2621_s10 = smov 8  }
  0x32   : > { %1820 = dma.hbm_to_vmem [thread:$0]  (!%p2259_p11), %s2643_s3, 512, %s2252_s11, [#allocation13], %s2619_s29, %s2619_s29, %s2621_s10  }
  0x33   : > { %p32_p1 = scmp.eq.s32.totalorder %s31_s15, 0  ;;  %p41_p2 = scmp.ne.s32.totalorder %s2143_s26, %s2139_s25 }
  0x34   : > { %p42_p6 = scmp.eq.s32.totalorder %s2147_s27, 0  ;;  %p1840_p10 = scmp.lt.s32.totalorder %s2147_s27, 2 }
  0x35   : > { %s2304_s18 = scalar_select %p32_p1, %s2143_s26, %s34_s14  }
  0x36   : > { %p43_p3 = por %p42_p6, %p41_p2  ;;  %p2645_p5 = scmp.eq.s32.totalorder %s2229_s28, 1 }
  0x37   : > { %2644 = sst [smem:[#allocation22_spill]] %s2304_s18  ;;  %s2620_s20 = sand.u32 1, %s2143_s26  }
  0x38   : > { %p2308_p7 = por %p2645_p5, %p41_p2  ;;  %s2314_s21 = sshll.u32 %s2147_s27, 7 }
  0x39   : > { %s2318_s22 = sshll.u32 %s2620_s20, 3  ;;  %p2320_p9 = pnand %p1840_p10, %p43_p3 }
  0x3a   : > { %s2646_s19 = scalar_select %p2308_p7, 1, 0 }
  0x3b   : > { %s2647_s11 = scalar_select %p2320_p9, 1, 0 }
  0x3c   : > { %s283_s14 = sand.u32 1, %s2147_s27   ;;  %s2648_s1 = sld [smem:[#allocation23_spill]] }
  0x3d   : > { %s287_s17 = scalar_lea.vmem [#allocation9], %s2318_s22  ;;  %s2334_s20 = scalar_lea.sflag [#allocation10], %s283_s14 }
  0x3e   : > { %s294_s29 = sshll.u32 %s287_s17, 4  ;;  %p2340_p0 = pneg %p2320_p9  ;;  %s2332_s29 = int_to_ptr.vmem [resolvable:$true] %s294_s29 }
  0x40   : > { %s2649_s3 = scalar_select %p2340_p0, 1, 0 }
  0x42   : > { %s2329_s16 = scalar_lea.hbm %s2648_s1, %s2314_s21  ;;  %s1960_s18 = scalar_lea.hbm %s2648_s1, 256 }
  0x43   : > { %s1955_s10 = scalar_lea.hbm %s2329_s16, 128  ;;  %p1961_p6 = scmp.lt.u32.totalorder %s2329_s16, %s2648_s1 }
  0x44   : > { %p1956_p12 = scmp.ne.s32.totalorder %s2329_s16, %s1955_s10  ;;  %p1962_p10 = scmp.lt.u32.totalorder %s1960_s18, %s1955_s10 }
  0x45   : > { %p1964_p5 = scmp.lt.u32.totalorder %s1955_s10, %s2329_s16 }
  0x46   : > { %p1958_p1 = pnand %p2340_p0, %p1956_p12  ;;  %p1963_p3 = por %p1962_p10, %p1961_p6 }
  0x48   : > { %p1959_p2 = pneg %p1958_p1  ;;  %p1965_p13 = por %p1964_p5, %p1963_p3 }
  0x4a   : > { %p1966_p7 = pnand %p1965_p13, %p1959_p2 }
  0x4c   : > { %1969 = shalt.err (!%p1966_p7)
}
  0x4d   : > { %s1970_s14 = scalar_lea.vmem %s2332_s29, 128  ;;  %s2152_s15 = smov [#allocation9]  }
  0x4e   : > { %p1971_p12 = scmp.ne.s32.totalorder %s2332_s29, %s1970_s14  ;;  %s1975_s23 = sshll.u32 %s2152_s15, 4  ;;  %s1976_s23 = int_to_ptr.vmem [resolvable:$false] %s1975_s23 }
  0x4f   : > { %s1977_s13 = scalar_lea.vmem %s1976_s23, 256  ;;  %p1978_p8 = scmp.lt.s32.totalorder %s2332_s29, %s1976_s23 }
  0x50   : > { %p1973_p1 = pnand %p1971_p12, %p2340_p0  ;;  %p1979_p11 = scmp.lt.s32.totalorder %s1977_s13, %s1970_s14 }
  0x52   : > { %p1974_p4 = pneg %p1973_p1  ;;  %p1980_p6 = por %p1979_p11, %p1978_p8 }
  0x54   : > { %p1981_p10 = pnand %p1980_p6, %p1974_p4 }
  0x56   : > { %1984 = shalt.err (!%p1981_p10)
}
  0x57   : > { %1830 = dma.hbm_to_vmem [thread:$0]  (!%p2320_p9), %s2329_s16, 128, %s2332_s29, %s2334_s20  }
  0x58   : > { %s2153_s10 = smov [#allocation14]   ;;  %s1985_s15 = scalar_lea.hbm %s2615_s5, 512 }
  0x59   : > { %s248_s18 = sshll.u32 %s2153_s10, 4  ;;  %p1986_p8 = scmp.ne.s32.totalorder %s2615_s5, %s1985_s15  ;;  %s249_s18 = int_to_ptr.vmem [resolvable:$true] %s248_s18 }
  0x5a   : > { %p2650_p4 = scmp.ne.s32.totalorder %s2641_s12, 0  ;;  %p1992_p2 = scmp.lt.u32.totalorder %s1985_s15, %s2615_s5 }
  0x5c   : > { %p2651_p11 = pneg %p2650_p4 }
  0x5e   : > { %p1988_p13 = pnand %p1986_p8, %p2651_p11 }
  0x60   : > { %p1989_p7 = pneg %p1988_p13 }
  0x62   : > { %p1994_p3 = pnand %p1992_p2, %p1989_p7 }
  0x64   : > { %1997 = shalt.err (!%p1994_p3)
}
  0x65   : > { %s1998_s29 = scalar_lea.vmem %s249_s18, 512  ;;  %p2652_p12 = pmov %p2651_p11 }
  0x66   : > { %p1999_p5 = scmp.ne.s32.totalorder %s249_s18, %s1998_s29  ;;  %p2006_p10 = scmp.lt.s32.totalorder %s249_s18, %s249_s18 }
  0x67   : > { %p2007_p9 = scmp.lt.s32.totalorder %s1998_s29, %s1998_s29 }
  0x68   : > { %p2001_p1 = pnand %p1999_p5, %p2652_p12 }
  0x69   : > { %p2008_p0 = por %p2007_p9, %p2006_p10 }
  0x6a   : > { %p2002_p6 = pneg %p2001_p1 }
  0x6c   : > { %p2009_p8 = pnand %p2008_p0, %p2002_p6 }
  0x6e   : > { %2012 = shalt.err (!%p2009_p8)
}
  0x6f   : > { %s2653_s1 = smov 8   ;;  %s2654_s27 = smov 128  }
  0x70   : > { %1823 = dma.hbm_to_vmem [thread:$0]  (!%p2650_p4), %s2615_s5, 512, %s249_s18, [#allocation13], %s2654_s27, %s2654_s27, %s2653_s1  }
  0x71   : > { %s2391_s23 = scalar_lea.hbm %s2610_s0, %s2314_s21  ;;  %s269_s12 = scalar_lea.vmem [#allocation6], %s2318_s22 }
  0x72   : > { %s276_s14 = sshll.u32 %s269_s12, 4  ;;  %s2655_s13 = sand.u32 1, %s2143_s26   ;;  %s277_s14 = int_to_ptr.vmem [resolvable:$true] %s276_s14 }
  0x73   : > { %s266_s29 = scalar_lea.sflag [#allocation7], %s2655_s13  ;;  %s2013_s16 = scalar_lea.hbm %s2391_s23, 128 }
  0x74   : > { %p2014_p9 = scmp.ne.s32.totalorder %s2391_s23, %s2013_s16  ;;  %p2656_p0 = scmp.ne.s32.totalorder %s2649_s3, 0 }
  0x75   : > { %s2018_s27 = scalar_lea.hbm %s2610_s0, 256  ;;  %p2019_p4 = scmp.lt.u32.totalorder %s2391_s23, %s2610_s0 }
  0x76   : > { %p2016_p11 = pnand %p2014_p9, %p2656_p0  ;;  %p2020_p7 = scmp.lt.u32.totalorder %s2018_s27, %s2013_s16 }
  0x77   : > { %p2022_p3 = scmp.lt.u32.totalorder %s2013_s16, %s2391_s23 }
  0x78   : > { %p2017_p13 = pneg %p2016_p11  ;;  %p2021_p2 = por %p2020_p7, %p2019_p4 }
  0x7a   : > { %p2023_p5 = por %p2022_p3, %p2021_p2 }
  0x7c   : > { %p2024_p12 = pnand %p2023_p5, %p2017_p13 }
  0x7e   : > { %2027 = shalt.err (!%p2024_p12)
}
  0x7f   : > { %s2028_s15 = scalar_lea.vmem %s277_s14, 128  ;;  %s2154_s12 = smov [#allocation6]  }
  0x80   : > { %p2029_p1 = scmp.ne.s32.totalorder %s277_s14, %s2028_s15  ;;  %s2033_s13 = sshll.u32 %s2154_s12, 4  ;;  %s2034_s13 = int_to_ptr.vmem [resolvable:$false] %s2033_s13 }
  0x81   : > { %s2035_s18 = scalar_lea.vmem %s2034_s13, 256  ;;  %p2036_p8 = scmp.lt.s32.totalorder %s277_s14, %s2034_s13 }
  0x82   : > { %p2031_p6 = pnand %p2029_p1, %p2656_p0  ;;  %p2037_p9 = scmp.lt.s32.totalorder %s2035_s18, %s2028_s15 }
  0x84   : > { %p2032_p10 = pneg %p2031_p6  ;;  %p2038_p11 = por %p2037_p9, %p2036_p8 }
  0x86   : > { %p2039_p4 = pnand %p2038_p11, %p2032_p10 }
  0x88   : > { %2042 = shalt.err (!%p2039_p4)
}
  0x89   : > { %p2657_p7 = scmp.ne.s32.totalorder %s2647_s11, 0  ;;  %s2417_s27 = scalar_lea.hbm %s2612_s2, %s2314_s21 }
  0x8a   : > { %s305_s10 = scalar_lea.vmem [#allocation11], %s2318_s22  ;;  %s2043_s15 = scalar_lea.hbm %s2417_s27, 128 }
  0x8b   : > { %1827 = dma.hbm_to_vmem [thread:$0]  (!%p2657_p7), %s2391_s23, 128, %s277_s14, %s266_s29  }
  0x8c   : > { %s312_s17 = sshll.u32 %s305_s10, 4  ;;  %p2044_p13 = scmp.ne.s32.totalorder %s2417_s27, %s2043_s15  ;;  %s313_s17 = int_to_ptr.vmem [resolvable:$true] %s312_s17 }
  0x8d   : > { %s2048_s23 = scalar_lea.hbm %s2612_s2, 256  ;;  %p2049_p5 = scmp.lt.u32.totalorder %s2417_s27, %s2612_s2 }
  0x8e   : > { %p2046_p2 = pnand %p2044_p13, %p2656_p0  ;;  %p2050_p12 = scmp.lt.u32.totalorder %s2048_s23, %s2043_s15 }
  0x8f   : > { %p2052_p6 = scmp.lt.u32.totalorder %s2043_s15, %s2417_s27 }
  0x90   : > { %p2047_p3 = pneg %p2046_p2  ;;  %p2051_p1 = por %p2050_p12, %p2049_p5 }
  0x92   : > { %p2053_p10 = por %p2052_p6, %p2051_p1 }
  0x94   : > { %p2054_p8 = pnand %p2053_p10, %p2047_p3 }
  0x96   : > { %2057 = shalt.err (!%p2054_p8)
}
  0x97   : > { %s2058_s21 = scalar_lea.vmem %s313_s17, 128  ;;  %s2155_s22 = smov [#allocation11]  }
  0x98   : > { %p2059_p9 = scmp.ne.s32.totalorder %s313_s17, %s2058_s21  ;;  %s2063_s18 = sshll.u32 %s2155_s22, 4  ;;  %s2064_s18 = int_to_ptr.vmem [resolvable:$false] %s2063_s18 }
  0x99   : > { %s2065_s16 = scalar_lea.vmem %s2064_s18, 256  ;;  %p2066_p13 = scmp.lt.s32.totalorder %s313_s17, %s2064_s18 }
  0x9a   : > { %p2061_p11 = pnand %p2059_p9, %p2656_p0  ;;  %p2067_p2 = scmp.lt.s32.totalorder %s2065_s16, %s2058_s21 }
  0x9c   : > { %p2062_p4 = pneg %p2061_p11  ;;  %p2068_p7 = por %p2067_p2, %p2066_p13 }
  0x9e   : > { %p2069_p5 = pnand %p2068_p7, %p2062_p4 }
  0xa0   : > { %2072 = shalt.err (!%p2069_p5)
}
  0xa1   : > { %p2658_p12 = scmp.ne.s32.totalorder %s2647_s11, 0  ;;  %p2659_p3 = scmp.ne.s32.totalorder %s2640_s9, 0 }
  0xa2   : > { %s2441_s3 = sand.u32 (!%p2659_p3), 1, %s2139_s25   ;;  %p2660_p0 = scmp.ne.s32.totalorder (!%p2659_p3), %s2638_s30, 0 }
  0xa3   : > { %1833 = dma.hbm_to_vmem [thread:$0]  (!%p2658_p12), %s2417_s27, 128, %s313_s17, %s2334_s20  }
  0xa4   : > { %321 = sbr.rel (%p2659_p3) target bundleno = 2172 (0x87c), region = 48  ;;  %s2444_s1 = sshll.u32 (!%p2659_p3), %s2441_s3, 3 }
  0xa5   : > { %s324_s10 = scalar_lea.sflag (!%p2659_p3), [#allocation7], %s2441_s3  ;;  %s327_s15 = scalar_lea.vmem (!%p2659_p3), [#allocation6], %s2444_s1 }
  0xab   : > { %2118 = dma.done.wait (%p2660_p0), %s324_s10, 128  }
  0xac   : > { %2120 = vsyncadd (%p2660_p0), %s324_s10, 4294967168  ;;  %s332_s9 = sand.u32 1, %s2229_s28   ;;  %s336_s11 = scalar_lea.vmem [#allocation9], %s2444_s1 }
  0xad   : > { %s333_s20 = scalar_lea.sflag [#allocation10], %s332_s9 }
  0xae   : > { %2122 = dma.done.wait (%p2660_p0), %s333_s20, 256  }
  0xaf   : > { %2124 = vsyncadd (%p2660_p0), %s333_s20, 4294967040  ;;  %s345_s27 = scalar_lea.vmem [#allocation11], %s2444_s1  ;;  %p2661_p7 = scmp.eq.s32.totalorder %s2229_s28, 0 }
  0xb1   : > { %2126 = dma.done.wait (%p2661_p7), [#allocation13], 1024   ;;  %p2662_p1 = pmov %p2661_p7 }
  0xb2   : > { %v2156_v0 = vmov 0.0|0.0   ;;  %vm2157_vm0 = vmmov 0   ;;  %v2158_v1 = vmov 0.0   ;;  %v482_v2 = vld [vmem:[#allocation12] sm:$0xff]  ;;  %v483_v3 = vld [vmem:[#allocation12 + $0x8] sm:$0xff]  ;;  %v484_v4 = vld [vmem:[#allocation12 + $0x10] sm:$0xff] }
  0xb3   : > { %2128 = vsyncadd (%p2662_p1), [#allocation13], 4294966272  ;;  %1783 = vmatprep.subr.bf16.mxu1 %v2156_v0  ;;  %1777 = vmatprep.subr.bf16.mxu0 %v2156_v0  ;;  %v1891_v5 = vpack.i.bf16 %v483_v3, %v482_v2  ;;  %v485_v6 = vld [vmem:[#allocation12 + $0x18] sm:$0xff]  ;;  %v1778_v7 = vpack.c.bf16 %v483_v3, %v482_v2  ;;  %v2472_v8 = vld [vmem:[%s2614_s4] ss:$0 sm:$0xff]  ;;  %s2159_s12 = smov 96  }
  0xb4   : > { %1712 = vmatprep.mubr.msk.f32.mxu1 %vm2157_vm0, %v2158_v1  ;;  %1701 = vmatprep.mubr.msk.f32.mxu0 %vm2157_vm0, %v2158_v1  ;;  %v1896_v9 = vpack.i.bf16 %v485_v6, %v484_v4  ;;  %v1781_v10 = vpack.c.bf16 %v485_v6, %v484_v4  ;;  %v395_v11 = vld [vmem:[%s327_s15] sm:$0xff]  ;;  %vm406_vm1 = vcmask 261120   ;;  %v481_v20 = vld [vmem:[%s336_s11] sm:$0xff]  ;;  %s2160_s13 = smov 64   ;;  %vm680_vm2 = vcmask 64512   ;;  %s2161_s23 = smov 120  }
  0xb5   : > { %1892 = vrot.lane.b32.xlu0 %v1891_v5, %s2159_s12  ;;  %1779 = vmatpush3.bf16.msra.mxu0 %v1778_v7  ;;  %v579_v38 = vld [vmem:[%s345_s27] sm:$0xff]  ;;  %s2162_s14 = smov 112   ;;  %s2163_s29 = smov 104   ;;  %vm1023_vm3 = vcmask 130112   ;;  %vm1203_vm4 = vcmask 195712   ;;  %vm1383_vm5 = vcmask 261312  }
  0xb6   : > { %1780 = vmatprep.subr.bf16.mxu0 %v2156_v0  ;;  %502 = vrot.lane.b32.xlu1 %v2472_v8, %s2159_s12  ;;  %s2164_s21 = smov 8   ;;  %s2165_s22 = smov 16  }
  0xb7   : > { %s2166_s18 = smov 24   ;;  %s1654_s15 = sshll.u32 %s2229_s28, 7 }
  0xb8   : > { %s393_s9 = scalar_lea.vmem [#allocation15], %s2444_s1  ;;  %s2565_s30 = scalar_lea.hbm %s2617_s7, %s1654_s15 }
  0xb9   : > { %1897 = vrot.lane.b32.xlu0 %v1896_v9, %s2159_s12  ;;  %1782 = vmatpush3.bf16.msra.mxu0 %v1781_v10  ;;  %s1485_s20 = sshll.u32 %s393_s9, 4  ;;  %s1472_s17 = scalar_lea.sflag [#allocation8], %s2441_s3  ;;  %s2567_s20 = int_to_ptr.vmem [resolvable:$true] %s1485_s20 }
  0xba   : > { %1789 = vmatprep.subr.bf16.mxu0 %v2156_v0  ;;  %1902 = vrot.lane.b32.xlu1 %v1891_v5, %s2160_s13  ;;  %s2073_s12 = scalar_lea.vmem %s2567_s20, 128  ;;  %p2663_p10 = scmp.ne.s32.totalorder %s2646_s19, 0 }
  0xbb   : > { %p2074_p6 = scmp.ne.s32.totalorder %s2567_s20, %s2073_s12  ;;  %s2167_s28 = smov [#allocation15]  }
  0xbc   : > { %1702 = vmatmul.mubr.msk.f32.vlgmr.msra.gmra.mrb[0].mxu0 %vm406_vm1, %v395_v11  ;;  %s2077_s1 = sshll.u32 %s2167_s28, 4  ;;  %s2078_s1 = int_to_ptr.vmem [resolvable:$false] %s2077_s1 }
  0xbd   : > { %1723 = vmatprep.mubr.msk.f32.mxu0 %vm2157_vm0, %v2158_v1  ;;  %1907 = vrot.lane.b32.xlu0 %v1896_v9, %s2160_s13  ;;  %p2075_p8 = pnand %p2074_p6, %p2663_p10  ;;  %p2080_p11 = scmp.lt.s32.totalorder %s2567_s20, %s2078_s1 }
  0xbf   : > { %p2076_p9 = pneg %p2075_p8 }
 0x127   : > { %v1893_v12 = vpop.permute.xlu0 %1892 }
 0x128   : > { %v1895_v13 = vunpack.i.h.bf16 %v1893_v12  ;;  %v1894_v14 = vunpack.i.l.bf16 %v1893_v12  ;;  %v503_v24 = vpop.permute.xlu1 %502 }
 0x12a   : > { %v1784_v15 = vpack.c.bf16 %v1895_v13, %v1894_v14 }
 0x12b   : > { %v1898_v16 = vpop.permute.xlu0 %1897 }
 0x12c   : > { %v1900_v17 = vunpack.i.h.bf16 %v1898_v16  ;;  %v1899_v18 = vunpack.i.l.bf16 %v1898_v16  ;;  %1785 = vmatpush3.bf16.msra.mxu1 %v1784_v15  ;;  %v1903_v30 = vpop.permute.xlu1 %1902 }
 0x12d   : > { %1786 = vmatprep.subr.bf16.mxu1 %v2156_v0  ;;  %v1905_v32 = vunpack.i.h.bf16 %v1903_v30  ;;  %v1904_v33 = vunpack.i.l.bf16 %v1903_v30 }
 0x12e   : > { %v1787_v19 = vpack.c.bf16 %v1900_v17, %v1899_v18 }
 0x12f   : > { %v1908_v31 = vpop.permute.xlu0 %1907  ;;  %v1790_v36 = vpack.c.bf16 %v1905_v32, %v1904_v33 }
 0x130   : > { %1788 = vmatpush3.bf16.msra.mxu1 %v1787_v19  ;;  %v1910_v34 = vunpack.i.h.bf16 %v1908_v31  ;;  %v1909_v35 = vunpack.i.l.bf16 %v1908_v31 }
 0x131   : > { %1726 = vmatprep.subr.mxu1 %v2158_v1  ;;  %1791 = vmatpush3.bf16.msra.mxu0 %v1790_v36 }
 0x132   : > { %v1793_v37 = vpack.c.bf16 %v1910_v34, %v1909_v35  ;;  %1792 = vmatprep.subr.bf16.mxu0 %v2156_v0 }
 0x133   : > { %1713 = vmatmul.mubr.msk.f32.vlgmr.msra.gmra.mrb[0].mxu1 %vm406_vm1, %v481_v20 }
 0x134   : > { %1728 = vmatprep.mubr.msk.f32.mxu1 %vm2157_vm0, %v2158_v1 }
 0x135   : > { %1794 = vmatpush3.bf16.msra.mxu0 %v1793_v37 }
 0x136   : > { %1746 = vmatprep.subr.mxu0 %v2158_v1 }
 0x138   : > { %1724 = vmatmul.mubr.msk.f32.vlgmr.msra.gmra.mrb[2].mxu0 %vm406_vm1, %v579_v38 }
 0x139   : > { %1748 = vmatprep.mubr.msk.f32.mxu0 %vm2157_vm0, %v2158_v1 }
 0x18f   : > { %v476_v21 = vpop.f32.mrb[0].mxu0 }
 0x190   : > { %v477_v22 = vadd.f32 %v2472_v8, %v476_v21  ;;  %v1703_v23 = vpop.f32.mrb[1].mxu0 }
 0x192   : > { %480 = vst.msk [vmem:[#allocation2] sm:$0xff] %vm406_vm1, %v477_v22 }
 0x199   : > { %v677_v29 = vld [vmem:[#allocation2] sm:$0xff] }
 0x206   : > { %v574_v25 = vpop.f32.mrb[0].mxu1 }
 0x207   : > { %v575_v26 = vadd.f32 %v574_v25, %v503_v24  ;;  %v1714_v27 = vpop.f32.mrb[1].mxu1 }
 0x209   : > { %578 = vst.msk [vmem:[#allocation3] sm:$0xff] %vm406_vm1, %v575_v26 }
 0x20b   : > { %v672_v47 = vpop.f32.mrb[2].mxu0 }
 0x20c   : > { %v1725_v48 = vpop.f32.mrb[3].mxu0 }
 0x210   : > { %v678_v28 = vld [vmem:[#allocation3] sm:$0xff] }
 0x211   : > { %1727 = vmatpush3.xpose.msk.msra.mxu1 %vm680_vm2, %v678_v28 }
 0x212   : > { %1731 = vmatprep.subr.mxu1 %v2158_v1 }
 0x214   : > { %1729 = vmatmul.mubr.msk.f32.vlgmr.msra.gmra.mrb[2].mxu1 %vm680_vm2, %v677_v29 }
 0x215   : > { %1733 = vmatprep.mubr.msk.f32.mxu1 %vm2157_vm0, %v2158_v1 }
 0x2e7   : > { %v753_v39 = vpop.f32.mrb[2].mxu1 }
 0x2e8   : > { %v1730_v40 = vpop.f32.mrb[3].mxu1  ;;  %v757_v41 = vsel %vm680_vm2, %v753_v39, -inf }
 0x2e9   : > { %758 = vmax.xlane.f32.xlu1 %v757_v41 }
 0x2fa   : > { %852 = vrot.lane.b32.xlu1 %v678_v28, %s2161_s23 }
 0x2fe   : > { %849 = vrot.lane.b32.xlu1 %v677_v29, %s2161_s23 }
 0x302   : > { %1029 = vrot.lane.b32.xlu1 %v677_v29, %s2162_s14 }
 0x306   : > { %1209 = vrot.lane.b32.xlu1 %v677_v29, %s2163_s29 }
 0x376   : > { %v759_v42 = vpop.xlane.xlu1 %758 }
 0x377   : > { %v760_v43 = vsub.f32 %v753_v39, %v759_v42 }
 0x379   : > { %v761_v44 = vmul.f32 1.442695, %v760_v43 }
 0x37a   : > { %v853_v49 = vpop.permute.xlu1 %852 }
 0x37b   : > { %1911 = vpow2.f32 %v761_v44 }
 0x37e   : > { %v850_v51 = vpop.permute.xlu1 %849 }
 0x382   : > { %v1030_v55 = vpop.permute.xlu1 %1029 }
 0x385   : > { %v1912_v45 = vpop.eup %1911 }
 0x386   : > { %v763_v46 = vsel %vm680_vm2, %v1912_v45, 0.0  ;;  %v1210_v61 = vpop.permute.xlu1 %1209 }
 0x387   : > { %764 = vadd.xlane.f32.xlu0 %v763_v46 }
 0x39d   : > { %600 = vrot.lane.b32.xlu0 %v2472_v8, %s2160_s13  ;;  %s2079_s13 = scalar_lea.vmem %s2078_s1, 256 }
 0x39e   : > { %p2081_p4 = scmp.lt.s32.totalorder %s2079_s13, %s2073_s12 }
 0x3a0   : > { %p2082_p13 = por %p2081_p4, %p2080_p11 }
 0x3a1   : > { %1032 = vrot.lane.b32.xlu0 %v678_v28, %s2162_s14 }
 0x3a2   : > { %p2083_p2 = pnand %p2082_p13, %p2076_p9 }
 0x3a5   : > { %1212 = vrot.lane.b32.xlu0 %v678_v28, %s2163_s29 }
 0x414   : > { %v765_v50 = vpop.xlane.xlu0 %764 }
 0x415   : > { %1913 = vrcp.f32 %v765_v50 }
 0x418   : > { %v601_v52 = vpop.permute.xlu0 %600 }
 0x419   : > { %v673_v53 = vadd.f32 %v672_v47, %v601_v52  ;;  %v1388_v52 = vld [vmem:[#allocation14 + $0x10] sm:$0xff] }
 0x41b   : > { %676 = vst.msk [vmem:[#allocation4] sm:$0xff] %vm406_vm1, %v673_v53  ;;  %v1389_v53 = vld [vmem:[#allocation14 + $0x18] sm:$0xff] }
 0x41c   : > { %v1033_v54 = vpop.permute.xlu0 %1032 }
 0x41d   : > { %1747 = vmatpush3.xpose.msk.msra.mxu0 %vm680_vm2, %v1033_v54  ;;  %v1799_v54 = vpack.c.bf16 %v1389_v53, %v1388_v52 }
 0x41e   : > { %1756 = vmatprep.subr.mxu0 %v2158_v1 }
 0x41f   : > { %v1914_v56 = vpop.eup %1913 }
 0x420   : > { %v767_v57 = vmul.f32 %v1914_v56, %v765_v50  ;;  %v1213_v58 = vpop.permute.xlu0 %1212  ;;  %1749 = vmatmul.mubr.msk.f32.vlgmr.msra.gmra.mrb[4].mxu0 %vm680_vm2, %v1030_v55  ;;  %v1387_v50 = vld [vmem:[#allocation14 + $0x8] sm:$0xff] }
 0x421   : > { %1757 = vmatpush3.xpose.msk.msra.mxu0 %vm680_vm2, %v1213_v58  ;;  %1758 = vmatprep.mubr.msk.f32.mxu0 %vm2157_vm0, %v2158_v1 }
 0x422   : > { %v768_v59 = vsub.f32 2.0, %v767_v57  ;;  %v679_v60 = vld [vmem:[#allocation4] sm:$0xff]  ;;  %1795 = vmatprep.subr.bf16.mxu0 %v2156_v0 }
 0x423   : > { %1732 = vmatpush3.msra.mxu1 %v679_v60 }
 0x424   : > { %v769_v62 = vmul.f32 %v1914_v56, %v768_v59  ;;  %1759 = vmatmul.mubr.msk.f32.vlgmr.msra.gmra.mrb[6].mxu0 %vm680_vm2, %v1210_v61  ;;  %1736 = vmatprep.subr.mxu1 %v2158_v1 }
 0x425   : > { %1774 = vmatprep.mubr.msk.f32.mxu0 %vm2157_vm0, %v2158_v1 }
 0x426   : > { %v770_v63 = vmul.f32 %v1912_v45, %v769_v62 }
 0x428   : > { %1734 = vmatmul.mubr.msk.f32.vlgmr.msra.gmra.mrb[4].mxu1 %vm680_vm2, %v770_v63  ;;  %v1651_v63 = vld [vmem:[%s2616_s6] ss:$0 sm:$0xff] }
 0x429   : > { %1738 = vmatprep.mubr.msk.f32.mxu1 %vm2157_vm0, %v2158_v1 }
 0x42a   : > { %1737 = vmatpush3.xpose.msk.msra.mxu1 %vm680_vm2, %v853_v49  ;;  %v1386_v49 = vld [vmem:[#allocation14] sm:$0xff] }
 0x42b   : > { %1741 = vmatprep.subr.mxu1 %v2158_v1 }
 0x42d   : > { %1739 = vmatmul.mubr.msk.f32.vlgmr.msra.gmra.mrb[6].mxu1 %vm680_vm2, %v850_v51  ;;  %v1796_v51 = vpack.c.bf16 %v1387_v50, %v1386_v49 }
 0x42e   : > { %1743 = vmatprep.mubr.msk.f32.mxu1 %vm2157_vm0, %v2158_v1 }
 0x42f   : > { %1797 = vmatpush3.bf16.msra.mxu0 %v1796_v51 }
 0x430   : > { %1798 = vmatprep.subr.bf16.mxu0 %v2156_v0 }
 0x433   : > { %1800 = vmatpush3.bf16.msra.mxu0 %v1799_v54 }
 0x4f3   : > { %v1104_v2 = vpop.f32.mrb[4].mxu0 }
 0x4f4   : > { %v1750_v3 = vpop.f32.mrb[5].mxu0  ;;  %v1108_v4 = vsel %vm680_vm2, %v1104_v2, -inf }
 0x4f5   : > { %1109 = vmax.xlane.f32.xlu1 %v1108_v4 }
 0x4f7   : > { %v1284_v5 = vpop.f32.mrb[6].mxu0 }
 0x4f8   : > { %v1760_v6 = vpop.f32.mrb[7].mxu0  ;;  %v1288_v12 = vsel %vm680_vm2, %v1284_v5, -inf }
 0x4fb   : > { %v840_v7 = vpop.f32.mrb[4].mxu1 }
 0x4fc   : > { %844 = vst.msk [vmem:[#allocation5] sm:$0xff] %vm680_vm2, %v840_v7  ;;  %v1735_v8 = vpop.f32.mrb[5].mxu1 }
 0x500   : > { %v924_v9 = vpop.f32.mrb[6].mxu1 }
 0x501   : > { %v1740_v10 = vpop.f32.mrb[7].mxu1  ;;  %v928_v11 = vsel %vm680_vm2, %v924_v9, -inf }
 0x502   : > { %929 = vmax.xlane.f32.xlu0 %v928_v11 }
 0x506   : > { %1289 = vmax.xlane.f32.xlu0 %v1288_v12 }
 0x582   : > { %v1110_v13 = vpop.xlane.xlu1 %1109 }
 0x583   : > { %v1111_v14 = vsub.f32 %v1104_v2, %v1110_v13 }
 0x585   : > { %v1112_v15 = vmul.f32 1.442695, %v1111_v14 }
 0x587   : > { %1915 = vpow2.f32 %v1112_v15 }
 0x58f   : > { %v930_v16 = vpop.xlane.xlu0 %929 }
 0x590   : > { %v931_v17 = vsub.f32 %v924_v9, %v930_v16 }
 0x591   : > { %v1916_v18 = vpop.eup %1915 }
 0x592   : > { %v932_v19 = vmul.f32 1.442695, %v931_v17  ;;  %v1114_v20 = vsel %vm680_vm2, %v1916_v18, 0.0 }
 0x593   : > { %1115 = vadd.xlane.f32.xlu1 %v1114_v20  ;;  %v1290_v21 = vpop.xlane.xlu0 %1289 }
 0x594   : > { %1917 = vpow2.f32 %v932_v19  ;;  %v1291_v22 = vsub.f32 %v1284_v5, %v1290_v21 }
 0x596   : > { %v1292_v23 = vmul.f32 1.442695, %v1291_v22 }
 0x598   : > { %1919 = vpow2.f32 %v1292_v23 }
 0x59e   : > { %v1918_v24 = vpop.eup %1917 }
 0x59f   : > { %v934_v25 = vsel %vm680_vm2, %v1918_v24, 0.0 }
 0x5a0   : > { %935 = vadd.xlane.f32.xlu0 %v934_v25 }
 0x5a2   : > { %v1920_v26 = vpop.eup %1919 }
 0x5a3   : > { %v1294_v27 = vsel %vm680_vm2, %v1920_v26, 0.0 }
 0x5a4   : > { %943 = vrot.lane.b32.xlu1 %v679_v60, %s2161_s23  ;;  %1295 = vadd.xlane.f32.xlu0 %v1294_v27 }
 0x5a8   : > { %1303 = vrot.lane.b32.xlu1 %v679_v60, %s2163_s29 }
 0x5ba   : > { %1123 = vrot.lane.b32.xlu0 %v679_v60, %s2162_s14 }
 0x620   : > { %v1116_v28 = vpop.xlane.xlu1 %1115 }
 0x621   : > { %1921 = vrcp.f32 %v1116_v28 }
 0x624   : > { %v944_v29 = vpop.permute.xlu1 %943 }
 0x625   : > { %1742 = vmatpush3.msra.mxu1 %v944_v29 }
 0x626   : > { %1751 = vmatprep.subr.mxu1 %v2158_v1 }
 0x628   : > { %v1304_v47 = vpop.permute.xlu1 %1303 }
 0x62b   : > { %v1922_v32 = vpop.eup %1921 }
 0x62c   : > { %v1118_v33 = vmul.f32 %v1922_v32, %v1116_v28 }
 0x62d   : > { %v936_v30 = vpop.xlane.xlu0 %935 }
 0x62e   : > { %1923 = vrcp.f32 %v936_v30  ;;  %v1119_v36 = vsub.f32 2.0, %v1118_v33 }
 0x630   : > { %v1120_v41 = vmul.f32 %v1922_v32, %v1119_v36 }
 0x631   : > { %v1296_v31 = vpop.xlane.xlu0 %1295 }
 0x632   : > { %1925 = vrcp.f32 %v1296_v31  ;;  %v1121_v45 = vmul.f32 %v1916_v18, %v1120_v41 }
 0x635   : > { %v1124_v44 = vpop.permute.xlu0 %1123 }
 0x638   : > { %v1924_v34 = vpop.eup %1923 }
 0x639   : > { %v938_v35 = vmul.f32 %v1924_v34, %v936_v30 }
 0x63b   : > { %v939_v37 = vsub.f32 2.0, %v938_v35 }
 0x63c   : > { %v1926_v38 = vpop.eup %1925 }
 0x63d   : > { %v940_v39 = vmul.f32 %v1924_v34, %v939_v37  ;;  %v1298_v40 = vmul.f32 %v1926_v38, %v1296_v31 }
 0x63f   : > { %v941_v42 = vmul.f32 %v1918_v24, %v940_v39  ;;  %v1299_v43 = vsub.f32 2.0, %v1298_v40 }
 0x641   : > { %1744 = vmatmul.mubr.msk.f32.vlgmr.msra.gmra.mrb[8].mxu1 %vm680_vm2, %v941_v42  ;;  %v1300_v46 = vmul.f32 %v1926_v38, %v1299_v43 }
 0x642   : > { %1752 = vmatpush3.msra.mxu1 %v1124_v44  ;;  %1753 = vmatprep.mubr.msk.f32.mxu1 %vm2157_vm0, %v2158_v1 }
 0x643   : > { %1761 = vmatprep.subr.mxu1 %v2158_v1  ;;  %v1301_v48 = vmul.f32 %v1920_v26, %v1300_v46 }
 0x645   : > { %1754 = vmatmul.mubr.msk.f32.vlgmr.msra.gmra.mrb[10].mxu1 %vm680_vm2, %v1121_v45 }
 0x646   : > { %1762 = vmatpush3.msra.mxu1 %v1304_v47  ;;  %1763 = vmatprep.mubr.msk.f32.mxu1 %vm2157_vm0, %v2158_v1 }
 0x649   : > { %1764 = vmatmul.mubr.msk.f32.vlgmr.msra.gmra.mrb[12].mxu1 %vm680_vm2, %v1301_v48 }
 0x714   : > { %v1015_v55 = vpop.f32.mrb[8].mxu1 }
 0x715   : > { %1020 = vrot.lane.b32.xlu1 %v1015_v55, %s2164_s21  ;;  %v1745_v56 = vpop.f32.mrb[9].mxu1 }
 0x718   : > { %v1195_v57 = vpop.f32.mrb[10].mxu1 }
 0x719   : > { %1200 = vrot.lane.b32.xlu0 %v1195_v57, %s2165_s22  ;;  %v1755_v1 = vpop.f32.mrb[11].mxu1 }
 0x71c   : > { %v1375_v58 = vpop.f32.mrb[12].mxu1 }
 0x71d   : > { %1380 = vrot.lane.b32.xlu1 %v1375_v58, %s2166_s18  ;;  %v1765_v59 = vpop.f32.mrb[13].mxu1 }
 0x787   : > { %v1021_v60 = vpop.permute.xlu1 %1020 }
 0x788   : > { %1024 = vst.msk [vmem:[#allocation5] sm:$0xff] %vm1023_vm3, %v1021_v60 }
 0x78b   : > { %v1201_v0 = vpop.permute.xlu0 %1200 }
 0x78c   : > { %1204 = vst.msk [vmem:[#allocation5] sm:$0xff] %vm1203_vm4, %v1201_v0 }
 0x78f   : > { %v1381_v61 = vpop.permute.xlu1 %1380 }
 0x790   : > { %1384 = vst.msk [vmem:[#allocation5] sm:$0xff] %vm1383_vm5, %v1381_v61 }
 0x797   : > { %v1385_v62 = vld [vmem:[#allocation5] sm:$0xff] }
 0x798   : > { %1775 = vmatmul.mubr.msk.f32.vlgmr.msra.gmra.mrb[8].mxu0 %vm406_vm1, %v1385_v62 }
 0x86b   : > { %v1466_v2 = vpop.f32.mrb[8].mxu0 }
 0x86c   : > { %v1467_v3 = vadd.f32 %v1651_v63, %v1466_v2  ;;  %v1776_v4 = vpop.f32.mrb[9].mxu0 }
 0x86e   : > { %1470 = vst.msk [vmem:[%s393_s9] sm:$0xff] %vm406_vm1, %v1467_v3 }
 0x86f   : > { %2086 = shalt.err (!%p2083_p2)
}
 0x870   : > { %s2087_s3 = scalar_lea.hbm %s2565_s30, 128  ;;  %s2091_s29 = scalar_lea.hbm %s2617_s7, 256 }
 0x871   : > { %p2088_p5 = scmp.ne.s32.totalorder %s2565_s30, %s2087_s3  ;;  %p2092_p0 = scmp.lt.u32.totalorder %s2565_s30, %s2617_s7 }
 0x872   : > { %p2093_p7 = scmp.lt.u32.totalorder %s2091_s29, %s2087_s3  ;;  %p2095_p6 = scmp.lt.u32.totalorder %s2087_s3, %s2565_s30 }
 0x873   : > { %p2089_p12 = pnand %p2088_p5, %p2663_p10 }
 0x874   : > { %p2094_p1 = por %p2093_p7, %p2092_p0 }
 0x875   : > { %p2090_p3 = pneg %p2089_p12 }
 0x876   : > { %p2096_p8 = por %p2095_p6, %p2094_p1 }
 0x878   : > { %p2097_p9 = pnand %p2096_p8, %p2090_p3 }
 0x87a   : > { %2100 = shalt.err (!%p2097_p9)
}
 0x87b   : > { %1815 = dma.vmem_to_hbm [thread:$0]  (%p2663_p10), %s2567_s20, 128, %s2565_s30, %s1472_s17  }
 0x87c PF: > { %s2664_s18 = sld [smem:[#allocation20_spill]]  ;;  %s1497_s16 = sand.u32 1, %s2135_s24  }
 0x87d   : > { %p2665_p11 = scmp.ne.s32.totalorder %s2639_s8, 0  ;;  %s1498_s10 = scalar_lea.sflag [#allocation8], %s1497_s16 }
 0x882   : > { %p2666_p4 = scmp.ge.s32.totalorder %s2664_s18, 2 }
 0x884   : > { %p1835_p13 = pnand %p2666_p4, %p2665_p11 }
 0x886   : > { %2130 = dma.done.wait (!%p1835_p13), %s1498_s10, 128  }
 0x887   : > { %2132 = vsyncadd (!%p1835_p13), %s1498_s10, 4294967168  ;;  %s2667_s27 = sld [smem:[#allocation21_spill]]  ;;  %s2668_s15 = sld [smem:[#allocation22_spill]] }
 0x888   : > { %s2669_s24 = smov %s2139_s25  ;;  %s2670_s25 = smov %s2143_s26 }
 0x88d   : > { %p24_p2 = scmp.ge.s32.totalorder %s2667_s27, 4   ;;  %s2671_s26 = smov %s2668_s15 }
 0x88f   :  { %26 = sbr.rel (!%p24_p2) target bundleno = 11 (0xb), region = 125 }
 0x896   :  { %1503 = vsyncpa [#allocation7], 1 }
 0x897   :  { %1505 = vsyncpa [#allocation7 + $0x1], 1 }
 0x898   :  { %1506 = vsyncpa [#allocation10], 1 }
 0x899   :  { %1508 = vsyncpa [#allocation10 + $0x1], 1 }
 0x89a   :  { %1509 = vsyncpa [#allocation13], 1 }
 0x89b   :  { %1510 = vsyncpa [#allocation8], 1 }
 0x89c   :  { %1512 = vsyncpa [#allocation8 + $0x1], 1 }

// kernel: tpu_custom_call.1
= control target key start
LH: loop header
LB: loop body
LE: loop exit
PB: predicated region body
PF: predicated region fallthrough
CT: control target
= control target key end

     0   :  { %s2610_s0 = inlined_call_operand.hbm [shape: f32[16,32], index: 0, kind: input, shape index: {}]   ;;  %s2611_s1 = inlined_call_operand.hbm [shape: f32[16,32], index: 1, kind: input, shape index: {}]   ;;  %s2612_s2 = inlined_call_operand.hbm [shape: f32[16,32], index: 2, kind: input, shape index: {}]   ;;  %s2613_s3 = inlined_call_operand.hbm [shape: f32[32,96], index: 3, kind: input, shape index: {}]   ;;  %s2614_s4 = inlined_call_operand.vmem [shape: f32[1,96], index: 4, kind: input, shape index: {}]   ;;  %s2615_s5 = inlined_call_operand.hbm [shape: f32[32,32], index: 5, kind: input, shape index: {}]   ;;  %s2616_s6 = inlined_call_operand.vmem [shape: f32[1,32], index: 6, kind: input, shape index: {}]   ;;  %s2617_s7 = inlined_call_operand.hbm [shape: f32[16,32], index: 7, kind: output, shape index: {}]  }
   0x1   :  { %2635 = sst [smem:[#allocation23_spill]] %s2611_s1 }
   0x2   :  { %2636 = sst [smem:[#allocation24_spill]] %s2613_s3 }
   0x3   :  { %12 = vsyncpa [#allocation7], 0 }
   0x4   :  { %14 = vsyncpa [#allocation7 + $0x1], 0 }
   0x5   :  { %15 = vsyncpa [#allocation10], 0 }
   0x6   :  { %17 = vsyncpa [#allocation10 + $0x1], 0 }
   0x7   :  { %18 = vsyncpa [#allocation13], 0 }
   0x8   :  { %19 = vsyncpa [#allocation8], 0 }
   0x9   :  { %21 = vsyncpa [#allocation8 + $0x1], 0  ;;  %s2208_s24 = smov 0   ;;  %s2210_s25 = smov 0  }
   0xa   :  { %s2212_s26 = smov 0   ;;  %s2214_s27 = smov 0  }
   0xb LB: > { %2637 = sst [smem:[#allocation20_spill]] %s2147_s27  ;;  %s2229_s28 = sadd.s32 4294967295, %s2147_s27   ;;  %s2147_s27 = sphi %s2214_s27, %s2667_s27   ;;  %s2143_s26 = sphi %s2212_s26, %s2671_s26   ;;  %s2139_s25 = sphi %s2210_s25, %s2670_s25   ;;  %s2135_s24 = sphi %s2208_s24, %s2669_s24  }
   0xc   : > { %s1617_s29 = sadd.s32 4294967294, %s2147_s27   ;;  %p47_p0 = scmp.ne.s32.totalorder %s2139_s25, %s2135_s24 }
   0xd   : > { %p2618_p1 = scmp.eq.s32.totalorder %s2229_s28, 0  ;;  %p213_p3 = scmp.eq.s32.totalorder %s1617_s29, 1 }
   0xe   : > { %p1618_p5 = scmp.ge.s32.totalorder %s2147_s27, 1  ;;  %p220_p7 = scmp.lt.s32.totalorder %s2147_s27, 3 }
   0xf   : > { %p2238_p4 = por %p2618_p1, %p47_p0  ;;  %p2243_p6 = por %p213_p3, %p47_p0 }
  0x10   : > { %p2248_p8 = pnand %p1618_p5, %p220_p7  ;;  %s2149_s10 = smov [#allocation12]  }
  0x11   : > { %s2638_s30 = scalar_select %p2238_p4, 1, 0 }
  0x12   : > { %s2639_s8 = scalar_select %p2243_p6, 1, 0 }
  0x13   : > { %s2640_s9 = scalar_select %p2248_p8, 1, 0 }
  0x14   : > { %s232_s11 = sshll.u32 %s2149_s10, 4  ;;  %p1817_p9 = pneg %p2248_p8  ;;  %s2252_s11 = int_to_ptr.vmem [resolvable:$true] %s232_s11 }
  0x15   : > { %s2264_s13 = sadd.s32 1, %s2147_s27   ;;  %s34_s14 = sadd.s32 1, %s2143_s26 }
  0x16   : > { %p2259_p11 = pnand %p1817_p9, %p2618_p1  ;;  %2642 = sst [smem:[#allocation21_spill]] %s2264_s13 }
  0x17   : > { %s31_s15 = ssub.s32 %s2147_s27, %s2264_s13  ;;  %s2643_s3 = sld [smem:[#allocation24_spill]] }
  0x18   : > { %s2641_s12 = scalar_select %p2259_p11, 1, 0 }
  0x19   : > { %p2624_p13 = pneg %p2259_p11 }
  0x1d   : > { %s1927_s18 = scalar_lea.hbm %s2643_s3, 512 }
  0x1e   : > { %p1928_p12 = scmp.ne.s32.totalorder %s2643_s3, %s1927_s18  ;;  %p1934_p5 = scmp.lt.u32.totalorder %s1927_s18, %s2643_s3 }
  0x20   : > { %p1930_p0 = pnand %p2624_p13, %p1928_p12 }
  0x22   : > { %p1931_p3 = pneg %p1930_p0 }
  0x24   : > { %p1936_p7 = pnand %p1934_p5, %p1931_p3 }
  0x26   : > { %1939 = shalt.err (!%p1936_p7)
}
  0x27   : > { %s1940_s23 = scalar_lea.vmem %s2252_s11, 512  ;;  %p1948_p2 = scmp.lt.s32.totalorder %s2252_s11, %s2252_s11 }
  0x28   : > { %p1941_p9 = scmp.ne.s32.totalorder %s2252_s11, %s1940_s23  ;;  %p1949_p12 = scmp.lt.s32.totalorder %s1940_s23, %s1940_s23 }
  0x2a   : > { %p1943_p10 = pnand %p1941_p9, %p2624_p13  ;;  %p1950_p0 = por %p1949_p12, %p1948_p2 }
  0x2c   : > { %p1944_p1 = pneg %p1943_p10 }
  0x2e   : > { %p1951_p6 = pnand %p1950_p0, %p1944_p1 }
  0x30   : > { %1954 = shalt.err (!%p1951_p6)
}
  0x31   : > { %s2619_s29 = smov 128   ;;  %s2621_s10 = smov 8  }
  0x32   : > { %1820 = dma.hbm_to_vmem [thread:$0]  (!%p2259_p11), %s2643_s3, 512, %s2252_s11, [#allocation13], %s2619_s29, %s2619_s29, %s2621_s10  }
  0x33   : > { %p32_p1 = scmp.eq.s32.totalorder %s31_s15, 0  ;;  %p41_p2 = scmp.ne.s32.totalorder %s2143_s26, %s2139_s25 }
  0x34   : > { %p42_p6 = scmp.eq.s32.totalorder %s2147_s27, 0  ;;  %p1840_p10 = scmp.lt.s32.totalorder %s2147_s27, 2 }
  0x35   : > { %s2304_s18 = scalar_select %p32_p1, %s2143_s26, %s34_s14  }
  0x36   : > { %p43_p3 = por %p42_p6, %p41_p2  ;;  %p2645_p5 = scmp.eq.s32.totalorder %s2229_s28, 1 }
  0x37   : > { %2644 = sst [smem:[#allocation22_spill]] %s2304_s18  ;;  %s2620_s20 = sand.u32 1, %s2143_s26  }
  0x38   : > { %p2308_p7 = por %p2645_p5, %p41_p2  ;;  %s2314_s21 = sshll.u32 %s2147_s27, 7 }
  0x39   : > { %s2318_s22 = sshll.u32 %s2620_s20, 3  ;;  %p2320_p9 = pnand %p1840_p10, %p43_p3 }
  0x3a   : > { %s2646_s19 = scalar_select %p2308_p7, 1, 0 }
  0x3b   : > { %s2647_s11 = scalar_select %p2320_p9, 1, 0 }
  0x3c   : > { %s283_s14 = sand.u32 1, %s2147_s27   ;;  %s2648_s1 = sld [smem:[#allocation23_spill]] }
  0x3d   : > { %s287_s17 = scalar_lea.vmem [#allocation9], %s2318_s22  ;;  %s2334_s20 = scalar_lea.sflag [#allocation10], %s283_s14 }
  0x3e   : > { %s294_s29 = sshll.u32 %s287_s17, 4  ;;  %p2340_p0 = pneg %p2320_p9  ;;  %s2332_s29 = int_to_ptr.vmem [resolvable:$true] %s294_s29 }
  0x40   : > { %s2649_s3 = scalar_select %p2340_p0, 1, 0 }
  0x42   : > { %s2329_s16 = scalar_lea.hbm %s2648_s1, %s2314_s21  ;;  %s1960_s18 = scalar_lea.hbm %s2648_s1, 256 }
  0x43   : > { %s1955_s10 = scalar_lea.hbm %s2329_s16, 128  ;;  %p1961_p6 = scmp.lt.u32.totalorder %s2329_s16, %s2648_s1 }
  0x44   : > { %p1956_p12 = scmp.ne.s32.totalorder %s2329_s16, %s1955_s10  ;;  %p1962_p10 = scmp.lt.u32.totalorder %s1960_s18, %s1955_s10 }
  0x45   : > { %p1964_p5 = scmp.lt.u32.totalorder %s1955_s10, %s2329_s16 }
  0x46   : > { %p1958_p1 = pnand %p2340_p0, %p1956_p12  ;;  %p1963_p3 = por %p1962_p10, %p1961_p6 }
  0x48   : > { %p1959_p2 = pneg %p1958_p1  ;;  %p1965_p13 = por %p1964_p5, %p1963_p3 }
  0x4a   : > { %p1966_p7 = pnand %p1965_p13, %p1959_p2 }
  0x4c   : > { %1969 = shalt.err (!%p1966_p7)
}
  0x4d   : > { %s1970_s14 = scalar_lea.vmem %s2332_s29, 128  ;;  %s2152_s15 = smov [#allocation9]  }
  0x4e   : > { %p1971_p12 = scmp.ne.s32.totalorder %s2332_s29, %s1970_s14  ;;  %s1975_s23 = sshll.u32 %s2152_s15, 4  ;;  %s1976_s23 = int_to_ptr.vmem [resolvable:$false] %s1975_s23 }
  0x4f   : > { %s1977_s13 = scalar_lea.vmem %s1976_s23, 256  ;;  %p1978_p8 = scmp.lt.s32.totalorder %s2332_s29, %s1976_s23 }
  0x50   : > { %p1973_p1 = pnand %p1971_p12, %p2340_p0  ;;  %p1979_p11 = scmp.lt.s32.totalorder %s1977_s13, %s1970_s14 }
  0x52   : > { %p1974_p4 = pneg %p1973_p1  ;;  %p1980_p6 = por %p1979_p11, %p1978_p8 }
  0x54   : > { %p1981_p10 = pnand %p1980_p6, %p1974_p4 }
  0x56   : > { %1984 = shalt.err (!%p1981_p10)
}
  0x57   : > { %1830 = dma.hbm_to_vmem [thread:$0]  (!%p2320_p9), %s2329_s16, 128, %s2332_s29, %s2334_s20  }
  0x58   : > { %s2153_s10 = smov [#allocation14]   ;;  %s1985_s15 = scalar_lea.hbm %s2615_s5, 512 }
  0x59   : > { %s248_s18 = sshll.u32 %s2153_s10, 4  ;;  %p1986_p8 = scmp.ne.s32.totalorder %s2615_s5, %s1985_s15  ;;  %s249_s18 = int_to_ptr.vmem [resolvable:$true] %s248_s18 }
  0x5a   : > { %p2650_p4 = scmp.ne.s32.totalorder %s2641_s12, 0  ;;  %p1992_p2 = scmp.lt.u32.totalorder %s1985_s15, %s2615_s5 }
  0x5c   : > { %p2651_p11 = pneg %p2650_p4 }
  0x5e   : > { %p1988_p13 = pnand %p1986_p8, %p2651_p11 }
  0x60   : > { %p1989_p7 = pneg %p1988_p13 }
  0x62   : > { %p1994_p3 = pnand %p1992_p2, %p1989_p7 }
  0x64   : > { %1997 = shalt.err (!%p1994_p3)
}
  0x65   : > { %s1998_s29 = scalar_lea.vmem %s249_s18, 512  ;;  %p2652_p12 = pmov %p2651_p11 }
  0x66   : > { %p1999_p5 = scmp.ne.s32.totalorder %s249_s18, %s1998_s29  ;;  %p2006_p10 = scmp.lt.s32.totalorder %s249_s18, %s249_s18 }
  0x67   : > { %p2007_p9 = scmp.lt.s32.totalorder %s1998_s29, %s1998_s29 }
  0x68   : > { %p2001_p1 = pnand %p1999_p5, %p2652_p12 }
  0x69   : > { %p2008_p0 = por %p2007_p9, %p2006_p10 }
  0x6a   : > { %p2002_p6 = pneg %p2001_p1 }
  0x6c   : > { %p2009_p8 = pnand %p2008_p0, %p2002_p6 }
  0x6e   : > { %2012 = shalt.err (!%p2009_p8)
}
  0x6f   : > { %s2653_s1 = smov 8   ;;  %s2654_s27 = smov 128  }
  0x70   : > { %1823 = dma.hbm_to_vmem [thread:$0]  (!%p2650_p4), %s2615_s5, 512, %s249_s18, [#allocation13], %s2654_s27, %s2654_s27, %s2653_s1  }
  0x71   : > { %s2391_s23 = scalar_lea.hbm %s2610_s0, %s2314_s21  ;;  %s269_s12 = scalar_lea.vmem [#allocation6], %s2318_s22 }
  0x72   : > { %s276_s14 = sshll.u32 %s269_s12, 4  ;;  %s2655_s13 = sand.u32 1, %s2143_s26   ;;  %s277_s14 = int_to_ptr.vmem [resolvable:$true] %s276_s14 }
  0x73   : > { %s266_s29 = scalar_lea.sflag [#allocation7], %s2655_s13  ;;  %s2013_s16 = scalar_lea.hbm %s2391_s23, 128 }
  0x74   : > { %p2014_p9 = scmp.ne.s32.totalorder %s2391_s23, %s2013_s16  ;;  %p2656_p0 = scmp.ne.s32.totalorder %s2649_s3, 0 }
  0x75   : > { %s2018_s27 = scalar_lea.hbm %s2610_s0, 256  ;;  %p2019_p4 = scmp.lt.u32.totalorder %s2391_s23, %s2610_s0 }
  0x76   : > { %p2016_p11 = pnand %p2014_p9, %p2656_p0  ;;  %p2020_p7 = scmp.lt.u32.totalorder %s2018_s27, %s2013_s16 }
  0x77   : > { %p2022_p3 = scmp.lt.u32.totalorder %s2013_s16, %s2391_s23 }
  0x78   : > { %p2017_p13 = pneg %p2016_p11  ;;  %p2021_p2 = por %p2020_p7, %p2019_p4 }
  0x7a   : > { %p2023_p5 = por %p2022_p3, %p2021_p2 }
  0x7c   : > { %p2024_p12 = pnand %p2023_p5, %p2017_p13 }
  0x7e   : > { %2027 = shalt.err (!%p2024_p12)
}
  0x7f   : > { %s2028_s15 = scalar_lea.vmem %s277_s14, 128  ;;  %s2154_s12 = smov [#allocation6]  }
  0x80   : > { %p2029_p1 = scmp.ne.s32.totalorder %s277_s14, %s2028_s15  ;;  %s2033_s13 = sshll.u32 %s2154_s12, 4  ;;  %s2034_s13 = int_to_ptr.vmem [resolvable:$false] %s2033_s13 }
  0x81   : > { %s2035_s18 = scalar_lea.vmem %s2034_s13, 256  ;;  %p2036_p8 = scmp.lt.s32.totalorder %s277_s14, %s2034_s13 }
  0x82   : > { %p2031_p6 = pnand %p2029_p1, %p2656_p0  ;;  %p2037_p9 = scmp.lt.s32.totalorder %s2035_s18, %s2028_s15 }
  0x84   : > { %p2032_p10 = pneg %p2031_p6  ;;  %p2038_p11 = por %p2037_p9, %p2036_p8 }
  0x86   : > { %p2039_p4 = pnand %p2038_p11, %p2032_p10 }
  0x88   : > { %2042 = shalt.err (!%p2039_p4)
}
  0x89   : > { %p2657_p7 = scmp.ne.s32.totalorder %s2647_s11, 0  ;;  %s2417_s27 = scalar_lea.hbm %s2612_s2, %s2314_s21 }
  0x8a   : > { %s305_s10 = scalar_lea.vmem [#allocation11], %s2318_s22  ;;  %s2043_s15 = scalar_lea.hbm %s2417_s27, 128 }
  0x8b   : > { %1827 = dma.hbm_to_vmem [thread:$0]  (!%p2657_p7), %s2391_s23, 128, %s277_s14, %s266_s29  }
  0x8c   : > { %s312_s17 = sshll.u32 %s305_s10, 4  ;;  %p2044_p13 = scmp.ne.s32.totalorder %s2417_s27, %s2043_s15  ;;  %s313_s17 = int_to_ptr.vmem [resolvable:$true] %s312_s17 }
  0x8d   : > { %s2048_s23 = scalar_lea.hbm %s2612_s2, 256  ;;  %p2049_p5 = scmp.lt.u32.totalorder %s2417_s27, %s2612_s2 }
  0x8e   : > { %p2046_p2 = pnand %p2044_p13, %p2656_p0  ;;  %p2050_p12 = scmp.lt.u32.totalorder %s2048_s23, %s2043_s15 }
  0x8f   : > { %p2052_p6 = scmp.lt.u32.totalorder %s2043_s15, %s2417_s27 }
  0x90   : > { %p2047_p3 = pneg %p2046_p2  ;;  %p2051_p1 = por %p2050_p12, %p2049_p5 }
  0x92   : > { %p2053_p10 = por %p2052_p6, %p2051_p1 }
  0x94   : > { %p2054_p8 = pnand %p2053_p10, %p2047_p3 }
  0x96   : > { %2057 = shalt.err (!%p2054_p8)
}
  0x97   : > { %s2058_s21 = scalar_lea.vmem %s313_s17, 128  ;;  %s2155_s22 = smov [#allocation11]  }
  0x98   : > { %p2059_p9 = scmp.ne.s32.totalorder %s313_s17, %s2058_s21  ;;  %s2063_s18 = sshll.u32 %s2155_s22, 4  ;;  %s2064_s18 = int_to_ptr.vmem [resolvable:$false] %s2063_s18 }
  0x99   : > { %s2065_s16 = scalar_lea.vmem %s2064_s18, 256  ;;  %p2066_p13 = scmp.lt.s32.totalorder %s313_s17, %s2064_s18 }
  0x9a   : > { %p2061_p11 = pnand %p2059_p9, %p2656_p0  ;;  %p2067_p2 = scmp.lt.s32.totalorder %s2065_s16, %s2058_s21 }
  0x9c   : > { %p2062_p4 = pneg %p2061_p11  ;;  %p2068_p7 = por %p2067_p2, %p2066_p13 }
  0x9e   : > { %p2069_p5 = pnand %p2068_p7, %p2062_p4 }
  0xa0   : > { %2072 = shalt.err (!%p2069_p5)
}
  0xa1   : > { %p2658_p12 = scmp.ne.s32.totalorder %s2647_s11, 0  ;;  %p2659_p3 = scmp.ne.s32.totalorder %s2640_s9, 0 }
  0xa2   : > { %s2441_s3 = sand.u32 (!%p2659_p3), 1, %s2139_s25   ;;  %p2660_p0 = scmp.ne.s32.totalorder (!%p2659_p3), %s2638_s30, 0 }
  0xa3   : > { %1833 = dma.hbm_to_vmem [thread:$0]  (!%p2658_p12), %s2417_s27, 128, %s313_s17, %s2334_s20  }
  0xa4   : > { %321 = sbr.rel (%p2659_p3) target bundleno = 2172 (0x87c), region = 48  ;;  %s2444_s1 = sshll.u32 (!%p2659_p3), %s2441_s3, 3 }
  0xa5   : > { %s324_s10 = scalar_lea.sflag (!%p2659_p3), [#allocation7], %s2441_s3  ;;  %s327_s15 = scalar_lea.vmem (!%p2659_p3), [#allocation6], %s2444_s1 }
  0xab   : > { %2118 = dma.done.wait (%p2660_p0), %s324_s10, 128  }
  0xac   : > { %2120 = vsyncadd (%p2660_p0), %s324_s10, 4294967168  ;;  %s332_s9 = sand.u32 1, %s2229_s28   ;;  %s336_s11 = scalar_lea.vmem [#allocation9], %s2444_s1 }
  0xad   : > { %s333_s20 = scalar_lea.sflag [#allocation10], %s332_s9 }
  0xae   : > { %2122 = dma.done.wait (%p2660_p0), %s333_s20, 256  }
  0xaf   : > { %2124 = vsyncadd (%p2660_p0), %s333_s20, 4294967040  ;;  %s345_s27 = scalar_lea.vmem [#allocation11], %s2444_s1  ;;  %p2661_p7 = scmp.eq.s32.totalorder %s2229_s28, 0 }
  0xb1   : > { %2126 = dma.done.wait (%p2661_p7), [#allocation13], 1024   ;;  %p2662_p1 = pmov %p2661_p7 }
  0xb2   : > { %v2156_v0 = vmov 0.0|0.0   ;;  %vm2157_vm0 = vmmov 0   ;;  %v2158_v1 = vmov 0.0   ;;  %v482_v2 = vld [vmem:[#allocation12] sm:$0xff]  ;;  %v483_v3 = vld [vmem:[#allocation12 + $0x8] sm:$0xff]  ;;  %v484_v4 = vld [vmem:[#allocation12 + $0x10] sm:$0xff] }
  0xb3   : > { %2128 = vsyncadd (%p2662_p1), [#allocation13], 4294966272  ;;  %1783 = vmatprep.subr.bf16.mxu1 %v2156_v0  ;;  %1777 = vmatprep.subr.bf16.mxu0 %v2156_v0  ;;  %v1891_v5 = vpack.i.bf16 %v483_v3, %v482_v2  ;;  %v485_v6 = vld [vmem:[#allocation12 + $0x18] sm:$0xff]  ;;  %v1778_v7 = vpack.c.bf16 %v483_v3, %v482_v2  ;;  %v2472_v8 = vld [vmem:[%s2614_s4] ss:$0 sm:$0xff]  ;;  %s2159_s12 = smov 96  }
  0xb4   : > { %1712 = vmatprep.mubr.msk.f32.mxu1 %vm2157_vm0, %v2158_v1  ;;  %1701 = vmatprep.mubr.msk.f32.mxu0 %vm2157_vm0, %v2158_v1  ;;  %v1896_v9 = vpack.i.bf16 %v485_v6, %v484_v4  ;;  %v1781_v10 = vpack.c.bf16 %v485_v6, %v484_v4  ;;  %v395_v11 = vld [vmem:[%s327_s15] sm:$0xff]  ;;  %vm406_vm1 = vcmask 261120   ;;  %v481_v20 = vld [vmem:[%s336_s11] sm:$0xff]  ;;  %s2160_s13 = smov 64   ;;  %vm680_vm2 = vcmask 64512   ;;  %s2161_s23 = smov 120  }
  0xb5   : > { %1892 = vrot.lane.b32.xlu0 %v1891_v5, %s2159_s12  ;;  %1779 = vmatpush3.bf16.msra.mxu0 %v1778_v7  ;;  %v579_v38 = vld [vmem:[%s345_s27] sm:$0xff]  ;;  %s2162_s14 = smov 112   ;;  %s2163_s29 = smov 104   ;;  %vm1023_vm3 = vcmask 130112   ;;  %vm1203_vm4 = vcmask 195712   ;;  %vm1383_vm5 = vcmask 261312  }
  0xb6   : > { %1780 = vmatprep.subr.bf16.mxu0 %v2156_v0  ;;  %502 = vrot.lane.b32.xlu1 %v2472_v8, %s2159_s12  ;;  %s2164_s21 = smov 8   ;;  %s2165_s22 = smov 16  }
  0xb7   : > { %s2166_s18 = smov 24   ;;  %s1654_s15 = sshll.u32 %s2229_s28, 7 }
  0xb8   : > { %s393_s9 = scalar_lea.vmem [#allocation15], %s2444_s1  ;;  %s2565_s30 = scalar_lea.hbm %s2617_s7, %s1654_s15 }
  0xb9   : > { %1897 = vrot.lane.b32.xlu0 %v1896_v9, %s2159_s12  ;;  %1782 = vmatpush3.bf16.msra.mxu0 %v1781_v10  ;;  %s1485_s20 = sshll.u32 %s393_s9, 4  ;;  %s1472_s17 = scalar_lea.sflag [#allocation8], %s2441_s3  ;;  %s2567_s20 = int_to_ptr.vmem [resolvable:$true] %s1485_s20 }
  0xba   : > { %1789 = vmatprep.subr.bf16.mxu0 %v2156_v0  ;;  %1902 = vrot.lane.b32.xlu1 %v1891_v5, %s2160_s13  ;;  %s2073_s12 = scalar_lea.vmem %s2567_s20, 128  ;;  %p2663_p10 = scmp.ne.s32.totalorder %s2646_s19, 0 }
  0xbb   : > { %p2074_p6 = scmp.ne.s32.totalorder %s2567_s20, %s2073_s12  ;;  %s2167_s28 = smov [#allocation15]  }
  0xbc   : > { %1702 = vmatmul.mubr.msk.f32.vlgmr.msra.gmra.mrb[0].mxu0 %vm406_vm1, %v395_v11  ;;  %s2077_s1 = sshll.u32 %s2167_s28, 4  ;;  %s2078_s1 = int_to_ptr.vmem [resolvable:$false] %s2077_s1 }
  0xbd   : > { %1723 = vmatprep.mubr.msk.f32.mxu0 %vm2157_vm0, %v2158_v1  ;;  %1907 = vrot.lane.b32.xlu0 %v1896_v9, %s2160_s13  ;;  %p2075_p8 = pnand %p2074_p6, %p2663_p10  ;;  %p2080_p11 = scmp.lt.s32.totalorder %s2567_s20, %s2078_s1 }
  0xbf   : > { %p2076_p9 = pneg %p2075_p8 }
 0x127   : > { %v1893_v12 = vpop.permute.xlu0 %1892 }
 0x128   : > { %v1895_v13 = vunpack.i.h.bf16 %v1893_v12  ;;  %v1894_v14 = vunpack.i.l.bf16 %v1893_v12  ;;  %v503_v24 = vpop.permute.xlu1 %502 }
 0x12a   : > { %v1784_v15 = vpack.c.bf16 %v1895_v13, %v1894_v14 }
 0x12b   : > { %v1898_v16 = vpop.permute.xlu0 %1897 }
 0x12c   : > { %v1900_v17 = vunpack.i.h.bf16 %v1898_v16  ;;  %v1899_v18 = vunpack.i.l.bf16 %v1898_v16  ;;  %1785 = vmatpush3.bf16.msra.mxu1 %v1784_v15  ;;  %v1903_v30 = vpop.permute.xlu1 %1902 }
 0x12d   : > { %1786 = vmatprep.subr.bf16.mxu1 %v2156_v0  ;;  %v1905_v32 = vunpack.i.h.bf16 %v1903_v30  ;;  %v1904_v33 = vunpack.i.l.bf16 %v1903_v30 }
 0x12e   : > { %v1787_v19 = vpack.c.bf16 %v1900_v17, %v1899_v18 }
 0x12f   : > { %v1908_v31 = vpop.permute.xlu0 %1907  ;;  %v1790_v36 = vpack.c.bf16 %v1905_v32, %v1904_v33 }
 0x130   : > { %1788 = vmatpush3.bf16.msra.mxu1 %v1787_v19  ;;  %v1910_v34 = vunpack.i.h.bf16 %v1908_v31  ;;  %v1909_v35 = vunpack.i.l.bf16 %v1908_v31 }
 0x131   : > { %1726 = vmatprep.subr.mxu1 %v2158_v1  ;;  %1791 = vmatpush3.bf16.msra.mxu0 %v1790_v36 }
 0x132   : > { %v1793_v37 = vpack.c.bf16 %v1910_v34, %v1909_v35  ;;  %1792 = vmatprep.subr.bf16.mxu0 %v2156_v0 }
 0x133   : > { %1713 = vmatmul.mubr.msk.f32.vlgmr.msra.gmra.mrb[0].mxu1 %vm406_vm1, %v481_v20 }
 0x134   : > { %1728 = vmatprep.mubr.msk.f32.mxu1 %vm2157_vm0, %v2158_v1 }
 0x135   : > { %1794 = vmatpush3.bf16.msra.mxu0 %v1793_v37 }
 0x136   : > { %1746 = vmatprep.subr.mxu0 %v2158_v1 }
 0x138   : > { %1724 = vmatmul.mubr.msk.f32.vlgmr.msra.gmra.mrb[2].mxu0 %vm406_vm1, %v579_v38 }
 0x139   : > { %1748 = vmatprep.mubr.msk.f32.mxu0 %vm2157_vm0, %v2158_v1 }
 0x18f   : > { %v476_v21 = vpop.f32.mrb[0].mxu0 }
 0x190   : > { %v477_v22 = vadd.f32 %v2472_v8, %v476_v21  ;;  %v1703_v23 = vpop.f32.mrb[1].mxu0 }
 0x192   : > { %480 = vst.msk [vmem:[#allocation2] sm:$0xff] %vm406_vm1, %v477_v22 }
 0x199   : > { %v677_v29 = vld [vmem:[#allocation2] sm:$0xff] }
 0x206   : > { %v574_v25 = vpop.f32.mrb[0].mxu1 }
 0x207   : > { %v575_v26 = vadd.f32 %v574_v25, %v503_v24  ;;  %v1714_v27 = vpop.f32.mrb[1].mxu1 }
 0x209   : > { %578 = vst.msk [vmem:[#allocation3] sm:$0xff] %vm406_vm1, %v575_v26 }
 0x20b   : > { %v672_v47 = vpop.f32.mrb[2].mxu0 }
 0x20c   : > { %v1725_v48 = vpop.f32.mrb[3].mxu0 }
 0x210   : > { %v678_v28 = vld [vmem:[#allocation3] sm:$0xff] }
 0x211   : > { %1727 = vmatpush3.xpose.msk.msra.mxu1 %vm680_vm2, %v678_v28 }
 0x212   : > { %1731 = vmatprep.subr.mxu1 %v2158_v1 }
 0x214   : > { %1729 = vmatmul.mubr.msk.f32.vlgmr.msra.gmra.mrb[2].mxu1 %vm680_vm2, %v677_v29 }
 0x215   : > { %1733 = vmatprep.mubr.msk.f32.mxu1 %vm2157_vm0, %v2158_v1 }
 0x2e7   : > { %v753_v39 = vpop.f32.mrb[2].mxu1 }
 0x2e8   : > { %v1730_v40 = vpop.f32.mrb[3].mxu1  ;;  %v757_v41 = vsel %vm680_vm2, %v753_v39, -inf }
 0x2e9   : > { %758 = vmax.xlane.f32.xlu1 %v757_v41 }
 0x2fa   : > { %852 = vrot.lane.b32.xlu1 %v678_v28, %s2161_s23 }
 0x2fe   : > { %849 = vrot.lane.b32.xlu1 %v677_v29, %s2161_s23 }
 0x302   : > { %1029 = vrot.lane.b32.xlu1 %v677_v29, %s2162_s14 }
 0x306   : > { %1209 = vrot.lane.b32.xlu1 %v677_v29, %s2163_s29 }
 0x376   : > { %v759_v42 = vpop.xlane.xlu1 %758 }
 0x377   : > { %v760_v43 = vsub.f32 %v753_v39, %v759_v42 }
 0x379   : > { %v761_v44 = vmul.f32 1.442695, %v760_v43 }
 0x37a   : > { %v853_v49 = vpop.permute.xlu1 %852 }
 0x37b   : > { %1911 = vpow2.f32 %v761_v44 }
 0x37e   : > { %v850_v51 = vpop.permute.xlu1 %849 }
 0x382   : > { %v1030_v55 = vpop.permute.xlu1 %1029 }
 0x385   : > { %v1912_v45 = vpop.eup %1911 }
 0x386   : > { %v763_v46 = vsel %vm680_vm2, %v1912_v45, 0.0  ;;  %v1210_v61 = vpop.permute.xlu1 %1209 }
 0x387   : > { %764 = vadd.xlane.f32.xlu0 %v763_v46 }
 0x39d   : > { %600 = vrot.lane.b32.xlu0 %v2472_v8, %s2160_s13  ;;  %s2079_s13 = scalar_lea.vmem %s2078_s1, 256 }
 0x39e   : > { %p2081_p4 = scmp.lt.s32.totalorder %s2079_s13, %s2073_s12 }
 0x3a0   : > { %p2082_p13 = por %p2081_p4, %p2080_p11 }
 0x3a1   : > { %1032 = vrot.lane.b32.xlu0 %v678_v28, %s2162_s14 }
 0x3a2   : > { %p2083_p2 = pnand %p2082_p13, %p2076_p9 }
 0x3a5   : > { %1212 = vrot.lane.b32.xlu0 %v678_v28, %s2163_s29 }
 0x414   : > { %v765_v50 = vpop.xlane.xlu0 %764 }
 0x415   : > { %1913 = vrcp.f32 %v765_v50 }
 0x418   : > { %v601_v52 = vpop.permute.xlu0 %600 }
 0x419   : > { %v673_v53 = vadd.f32 %v672_v47, %v601_v52  ;;  %v1388_v52 = vld [vmem:[#allocation14 + $0x10] sm:$0xff] }
 0x41b   : > { %676 = vst.msk [vmem:[#allocation4] sm:$0xff] %vm406_vm1, %v673_v53  ;;  %v1389_v53 = vld [vmem:[#allocation14 + $0x18] sm:$0xff] }
 0x41c   : > { %v1033_v54 = vpop.permute.xlu0 %1032 }
 0x41d   : > { %1747 = vmatpush3.xpose.msk.msra.mxu0 %vm680_vm2, %v1033_v54  ;;  %v1799_v54 = vpack.c.bf16 %v1389_v53, %v1388_v52 }
 0x41e   : > { %1756 = vmatprep.subr.mxu0 %v2158_v1 }
 0x41f   : > { %v1914_v56 = vpop.eup %1913 }
 0x420   : > { %v767_v57 = vmul.f32 %v1914_v56, %v765_v50  ;;  %v1213_v58 = vpop.permute.xlu0 %1212  ;;  %1749 = vmatmul.mubr.msk.f32.vlgmr.msra.gmra.mrb[4].mxu0 %vm680_vm2, %v1030_v55  ;;  %v1387_v50 = vld [vmem:[#allocation14 + $0x8] sm:$0xff] }
 0x421   : > { %1757 = vmatpush3.xpose.msk.msra.mxu0 %vm680_vm2, %v1213_v58  ;;  %1758 = vmatprep.mubr.msk.f32.mxu0 %vm2157_vm0, %v2158_v1 }
 0x422   : > { %v768_v59 = vsub.f32 2.0, %v767_v57  ;;  %v679_v60 = vld [vmem:[#allocation4] sm:$0xff]  ;;  %1795 = vmatprep.subr.bf16.mxu0 %v2156_v0 }
 0x423   : > { %1732 = vmatpush3.msra.mxu1 %v679_v60 }
 0x424   : > { %v769_v62 = vmul.f32 %v1914_v56, %v768_v59  ;;  %1759 = vmatmul.mubr.msk.f32.vlgmr.msra.gmra.mrb[6].mxu0 %vm680_vm2, %v1210_v61  ;;  %1736 = vmatprep.subr.mxu1 %v2158_v1 }
 0x425   : > { %1774 = vmatprep.mubr.msk.f32.mxu0 %vm2157_vm0, %v2158_v1 }
 0x426   : > { %v770_v63 = vmul.f32 %v1912_v45, %v769_v62 }
 0x428   : > { %1734 = vmatmul.mubr.msk.f32.vlgmr.msra.gmra.mrb[4].mxu1 %vm680_vm2, %v770_v63  ;;  %v1651_v63 = vld [vmem:[%s2616_s6] ss:$0 sm:$0xff] }
 0x429   : > { %1738 = vmatprep.mubr.msk.f32.mxu1 %vm2157_vm0, %v2158_v1 }
 0x42a   : > { %1737 = vmatpush3.xpose.msk.msra.mxu1 %vm680_vm2, %v853_v49  ;;  %v1386_v49 = vld [vmem:[#allocation14] sm:$0xff] }
 0x42b   : > { %1741 = vmatprep.subr.mxu1 %v2158_v1 }
 0x42d   : > { %1739 = vmatmul.mubr.msk.f32.vlgmr.msra.gmra.mrb[6].mxu1 %vm680_vm2, %v850_v51  ;;  %v1796_v51 = vpack.c.bf16 %v1387_v50, %v1386_v49 }
 0x42e   : > { %1743 = vmatprep.mubr.msk.f32.mxu1 %vm2157_vm0, %v2158_v1 }
 0x42f   : > { %1797 = vmatpush3.bf16.msra.mxu0 %v1796_v51 }
 0x430   : > { %1798 = vmatprep.subr.bf16.mxu0 %v2156_v0 }
 0x433   : > { %1800 = vmatpush3.bf16.msra.mxu0 %v1799_v54 }
 0x4f3   : > { %v1104_v2 = vpop.f32.mrb[4].mxu0 }
 0x4f4   : > { %v1750_v3 = vpop.f32.mrb[5].mxu0  ;;  %v1108_v4 = vsel %vm680_vm2, %v1104_v2, -inf }
 0x4f5   : > { %1109 = vmax.xlane.f32.xlu1 %v1108_v4 }
 0x4f7   : > { %v1284_v5 = vpop.f32.mrb[6].mxu0 }
 0x4f8   : > { %v1760_v6 = vpop.f32.mrb[7].mxu0  ;;  %v1288_v12 = vsel %vm680_vm2, %v1284_v5, -inf }
 0x4fb   : > { %v840_v7 = vpop.f32.mrb[4].mxu1 }
 0x4fc   : > { %844 = vst.msk [vmem:[#allocation5] sm:$0xff] %vm680_vm2, %v840_v7  ;;  %v1735_v8 = vpop.f32.mrb[5].mxu1 }
 0x500   : > { %v924_v9 = vpop.f32.mrb[6].mxu1 }
 0x501   : > { %v1740_v10 = vpop.f32.mrb[7].mxu1  ;;  %v928_v11 = vsel %vm680_vm2, %v924_v9, -inf }
 0x502   : > { %929 = vmax.xlane.f32.xlu0 %v928_v11 }
 0x506   : > { %1289 = vmax.xlane.f32.xlu0 %v1288_v12 }
 0x582   : > { %v1110_v13 = vpop.xlane.xlu1 %1109 }
 0x583   : > { %v1111_v14 = vsub.f32 %v1104_v2, %v1110_v13 }
 0x585   : > { %v1112_v15 = vmul.f32 1.442695, %v1111_v14 }
 0x587   : > { %1915 = vpow2.f32 %v1112_v15 }
 0x58f   : > { %v930_v16 = vpop.xlane.xlu0 %929 }
 0x590   : > { %v931_v17 = vsub.f32 %v924_v9, %v930_v16 }
 0x591   : > { %v1916_v18 = vpop.eup %1915 }
 0x592   : > { %v932_v19 = vmul.f32 1.442695, %v931_v17  ;;  %v1114_v20 = vsel %vm680_vm2, %v1916_v18, 0.0 }
 0x593   : > { %1115 = vadd.xlane.f32.xlu1 %v1114_v20  ;;  %v1290_v21 = vpop.xlane.xlu0 %1289 }
 0x594   : > { %1917 = vpow2.f32 %v932_v19  ;;  %v1291_v22 = vsub.f32 %v1284_v5, %v1290_v21 }
 0x596   : > { %v1292_v23 = vmul.f32 1.442695, %v1291_v22 }
 0x598   : > { %1919 = vpow2.f32 %v1292_v23 }
 0x59e   : > { %v1918_v24 = vpop.eup %1917 }
 0x59f   : > { %v934_v25 = vsel %vm680_vm2, %v1918_v24, 0.0 }
 0x5a0   : > { %935 = vadd.xlane.f32.xlu0 %v934_v25 }
 0x5a2   : > { %v1920_v26 = vpop.eup %1919 }
 0x5a3   : > { %v1294_v27 = vsel %vm680_vm2, %v1920_v26, 0.0 }
 0x5a4   : > { %943 = vrot.lane.b32.xlu1 %v679_v60, %s2161_s23  ;;  %1295 = vadd.xlane.f32.xlu0 %v1294_v27 }
 0x5a8   : > { %1303 = vrot.lane.b32.xlu1 %v679_v60, %s2163_s29 }
 0x5ba   : > { %1123 = vrot.lane.b32.xlu0 %v679_v60, %s2162_s14 }
 0x620   : > { %v1116_v28 = vpop.xlane.xlu1 %1115 }
 0x621   : > { %1921 = vrcp.f32 %v1116_v28 }
 0x624   : > { %v944_v29 = vpop.permute.xlu1 %943 }
 0x625   : > { %1742 = vmatpush3.msra.mxu1 %v944_v29 }
 0x626   : > { %1751 = vmatprep.subr.mxu1 %v2158_v1 }
 0x628   : > { %v1304_v47 = vpop.permute.xlu1 %1303 }
 0x62b   : > { %v1922_v32 = vpop.eup %1921 }
 0x62c   : > { %v1118_v33 = vmul.f32 %v1922_v32, %v1116_v28 }
 0x62d   : > { %v936_v30 = vpop.xlane.xlu0 %935 }
 0x62e   : > { %1923 = vrcp.f32 %v936_v30  ;;  %v1119_v36 = vsub.f32 2.0, %v1118_v33 }
 0x630   : > { %v1120_v41 = vmul.f32 %v1922_v32, %v1119_v36 }
 0x631   : > { %v1296_v31 = vpop.xlane.xlu0 %1295 }
 0x632   : > { %1925 = vrcp.f32 %v1296_v31  ;;  %v1121_v45 = vmul.f32 %v1916_v18, %v1120_v41 }
 0x635   : > { %v1124_v44 = vpop.permute.xlu0 %1123 }
 0x638   : > { %v1924_v34 = vpop.eup %1923 }
 0x639   : > { %v938_v35 = vmul.f32 %v1924_v34, %v936_v30 }
 0x63b   : > { %v939_v37 = vsub.f32 2.0, %v938_v35 }
 0x63c   : > { %v1926_v38 = vpop.eup %1925 }
 0x63d   : > { %v940_v39 = vmul.f32 %v1924_v34, %v939_v37  ;;  %v1298_v40 = vmul.f32 %v1926_v38, %v1296_v31 }
 0x63f   : > { %v941_v42 = vmul.f32 %v1918_v24, %v940_v39  ;;  %v1299_v43 = vsub.f32 2.0, %v1298_v40 }
 0x641   : > { %1744 = vmatmul.mubr.msk.f32.vlgmr.msra.gmra.mrb[8].mxu1 %vm680_vm2, %v941_v42  ;;  %v1300_v46 = vmul.f32 %v1926_v38, %v1299_v43 }
 0x642   : > { %1752 = vmatpush3.msra.mxu1 %v1124_v44  ;;  %1753 = vmatprep.mubr.msk.f32.mxu1 %vm2157_vm0, %v2158_v1 }
 0x643   : > { %1761 = vmatprep.subr.mxu1 %v2158_v1  ;;  %v1301_v48 = vmul.f32 %v1920_v26, %v1300_v46 }
 0x645   : > { %1754 = vmatmul.mubr.msk.f32.vlgmr.msra.gmra.mrb[10].mxu1 %vm680_vm2, %v1121_v45 }
 0x646   : > { %1762 = vmatpush3.msra.mxu1 %v1304_v47  ;;  %1763 = vmatprep.mubr.msk.f32.mxu1 %vm2157_vm0, %v2158_v1 }
 0x649   : > { %1764 = vmatmul.mubr.msk.f32.vlgmr.msra.gmra.mrb[12].mxu1 %vm680_vm2, %v1301_v48 }
 0x714   : > { %v1015_v55 = vpop.f32.mrb[8].mxu1 }
 0x715   : > { %1020 = vrot.lane.b32.xlu1 %v1015_v55, %s2164_s21  ;;  %v1745_v56 = vpop.f32.mrb[9].mxu1 }
 0x718   : > { %v1195_v57 = vpop.f32.mrb[10].mxu1 }
 0x719   : > { %1200 = vrot.lane.b32.xlu0 %v1195_v57, %s2165_s22  ;;  %v1755_v1 = vpop.f32.mrb[11].mxu1 }
 0x71c   : > { %v1375_v58 = vpop.f32.mrb[12].mxu1 }
 0x71d   : > { %1380 = vrot.lane.b32.xlu1 %v1375_v58, %s2166_s18  ;;  %v1765_v59 = vpop.f32.mrb[13].mxu1 }
 0x787   : > { %v1021_v60 = vpop.permute.xlu1 %1020 }
 0x788   : > { %1024 = vst.msk [vmem:[#allocation5] sm:$0xff] %vm1023_vm3, %v1021_v60 }
 0x78b   : > { %v1201_v0 = vpop.permute.xlu0 %1200 }
 0x78c   : > { %1204 = vst.msk [vmem:[#allocation5] sm:$0xff] %vm1203_vm4, %v1201_v0 }
 0x78f   : > { %v1381_v61 = vpop.permute.xlu1 %1380 }
 0x790   : > { %1384 = vst.msk [vmem:[#allocation5] sm:$0xff] %vm1383_vm5, %v1381_v61 }
 0x797   : > { %v1385_v62 = vld [vmem:[#allocation5] sm:$0xff] }
 0x798   : > { %1775 = vmatmul.mubr.msk.f32.vlgmr.msra.gmra.mrb[8].mxu0 %vm406_vm1, %v1385_v62 }
 0x86b   : > { %v1466_v2 = vpop.f32.mrb[8].mxu0 }
 0x86c   : > { %v1467_v3 = vadd.f32 %v1651_v63, %v1466_v2  ;;  %v1776_v4 = vpop.f32.mrb[9].mxu0 }
 0x86e   : > { %1470 = vst.msk [vmem:[%s393_s9] sm:$0xff] %vm406_vm1, %v1467_v3 }
 0x86f   : > { %2086 = shalt.err (!%p2083_p2)
}
 0x870   : > { %s2087_s3 = scalar_lea.hbm %s2565_s30, 128  ;;  %s2091_s29 = scalar_lea.hbm %s2617_s7, 256 }
 0x871   : > { %p2088_p5 = scmp.ne.s32.totalorder %s2565_s30, %s2087_s3  ;;  %p2092_p0 = scmp.lt.u32.totalorder %s2565_s30, %s2617_s7 }
 0x872   : > { %p2093_p7 = scmp.lt.u32.totalorder %s2091_s29, %s2087_s3  ;;  %p2095_p6 = scmp.lt.u32.totalorder %s2087_s3, %s2565_s30 }
 0x873   : > { %p2089_p12 = pnand %p2088_p5, %p2663_p10 }
 0x874   : > { %p2094_p1 = por %p2093_p7, %p2092_p0 }
 0x875   : > { %p2090_p3 = pneg %p2089_p12 }
 0x876   : > { %p2096_p8 = por %p2095_p6, %p2094_p1 }
 0x878   : > { %p2097_p9 = pnand %p2096_p8, %p2090_p3 }
 0x87a   : > { %2100 = shalt.err (!%p2097_p9)
}
 0x87b   : > { %1815 = dma.vmem_to_hbm [thread:$0]  (%p2663_p10), %s2567_s20, 128, %s2565_s30, %s1472_s17  }
 0x87c PF: > { %s2664_s18 = sld [smem:[#allocation20_spill]]  ;;  %s1497_s16 = sand.u32 1, %s2135_s24  }
 0x87d   : > { %p2665_p11 = scmp.ne.s32.totalorder %s2639_s8, 0  ;;  %s1498_s10 = scalar_lea.sflag [#allocation8], %s1497_s16 }
 0x882   : > { %p2666_p4 = scmp.ge.s32.totalorder %s2664_s18, 2 }
 0x884   : > { %p1835_p13 = pnand %p2666_p4, %p2665_p11 }
 0x886   : > { %2130 = dma.done.wait (!%p1835_p13), %s1498_s10, 128  }
 0x887   : > { %2132 = vsyncadd (!%p1835_p13), %s1498_s10, 4294967168  ;;  %s2667_s27 = sld [smem:[#allocation21_spill]]  ;;  %s2668_s15 = sld [smem:[#allocation22_spill]] }
 0x888   : > { %s2669_s24 = smov %s2139_s25  ;;  %s2670_s25 = smov %s2143_s26 }
 0x88d   : > { %p24_p2 = scmp.ge.s32.totalorder %s2667_s27, 4   ;;  %s2671_s26 = smov %s2668_s15 }
 0x88f   :  { %26 = sbr.rel (!%p24_p2) target bundleno = 11 (0xb), region = 125 }
 0x896   :  { %1503 = vsyncpa [#allocation7], 1 }
 0x897   :  { %1505 = vsyncpa [#allocation7 + $0x1], 1 }
 0x898   :  { %1506 = vsyncpa [#allocation10], 1 }
 0x899   :  { %1508 = vsyncpa [#allocation10 + $0x1], 1 }
 0x89a   :  { %1509 = vsyncpa [#allocation13], 1 }
 0x89b   :  { %1510 = vsyncpa [#allocation8], 1 }
 0x89c   :  { %1512 = vsyncpa [#allocation8 + $0x1], 1 }

</bundles_post_ra>
